<compile_context>
chip_gen: v7x
topology: tpu7x:2x2x1
jax: 0.10.0
libtpu: 0.0.40
codegen_flags: <defaults>
</compile_context>

<pallas_src>
import functools

import numpy as np

import jax
import jax.numpy as jnp
from jax.experimental import pallas as pl
from jax.experimental.pallas import tpu as pltpu


def _agnostic_kernel(xt_ref, w0t_ref, w1t_ref, w2t_ref, a_ref, idx_ref,   # VMEM inputs
                     out_ref,                                             # VMEM (C, n_idx) f32
                     preds_a, preds_b, al_ref,                            # VMEM scratch
                     *, alpha: float, niter: int, tile_n: int, n_tiles: int,
                     n_idx: int, nclasses: int, compute_dtype):
    p = pl.program_id(0)        # phase: 0 = MLP, 1..niter = PPR power iterations
    i = pl.program_id(1)        # node tile within the phase
    unroll = n_tiles <= 8       # fully unroll short inner loops (LLO visibility)

    # ---- phase 0: transposed MLP of node tile i --------------------------------
    #   local^T[:, tile] = w2^T @ relu(w1^T @ relu(w0^T @ x^T[:, tile]))
    @pl.when(p == 0)
    def _mlp():
        h = jnp.dot(w0t_ref[...], xt_ref[...], preferred_element_type=jnp.float32)
        h = jnp.maximum(h, 0.0).astype(compute_dtype)      # ReLU in f32, cast only for MXU
        h = jnp.dot(w1t_ref[...], h, preferred_element_type=jnp.float32)
        h = jnp.maximum(h, 0.0).astype(compute_dtype)
        localT = jnp.dot(w2t_ref[...], h, preferred_element_type=jnp.float32)  # (C, tile_n) f32
        preds_a[i] = localT.astype(preds_a.dtype)          # preds_0 = local
        al_ref[i] = alpha * localT                         # hoisted alpha*local (f32)

    # ---- phases 1..niter: one PPR power-iteration step for node tile i ---------
    #   preds_t^T[:, tile i] = (1-alpha) * preds_{t-1}^T @ A[:, tile i]
    #                        + alpha * local^T[:, tile i]
    # (1-alpha) is a free per-tile scalar multiply (VPU filler in a mem-bound loop).
    def _ppr(src_ref, dst_ref):
        def body(j, acc):
            row0 = pl.multiple_of(j * tile_n, tile_n)
            a_jj = a_ref[pl.ds(row0, tile_n), :]           # (tile_n, tile_n)
            return acc + jnp.dot(src_ref[j], a_jj, preferred_element_type=jnp.float32)
        acc = jax.lax.fori_loop(0, n_tiles, body,
                                jnp.zeros((nclasses, tile_n), jnp.float32),
                                unroll=unroll)
        dst_ref[i] = ((1.0 - alpha) * acc + al_ref[i]).astype(dst_ref.dtype)

    @pl.when(jnp.logical_and(p > 0, p % 2 == 1))           # odd iteration: a -> b
    def _():
        _ppr(preds_a, preds_b)

    @pl.when(jnp.logical_and(p > 0, p % 2 == 0))           # even iteration: b -> a
    def _():
        _ppr(preds_b, preds_a)

    # Final buffer parity is static in niter (niter even -> preds_a, odd -> preds_b).
    final_ref = preds_a if (niter % 2 == 0) else preds_b

    # ---- last grid step: one-hot-matmul gather of idx columns + log_softmax ----
    # NOTE: relies on the _ppr (or _mlp when niter==0) write for the last tile
    # being traced BEFORE this block in the same invocation -- it is, see above.
    @pl.when(jnp.logical_and(p == niter, i == n_tiles - 1))
    def _gather_softmax():
        idx_row = idx_ref[...]                              # (1, n_idx) int32
        def gbody(j, acc):
            node = jax.lax.broadcasted_iota(jnp.int32, (tile_n, n_idx), 0) + j * tile_n
            onehot = (node == idx_row).astype(final_ref.dtype)      # (tile_n, n_idx)
            return acc + jnp.dot(final_ref[j], onehot,
                                 preferred_element_type=jnp.float32)
        sel = jax.lax.fori_loop(0, n_tiles, gbody,
                                jnp.zeros((nclasses, n_idx), jnp.float32),
                                unroll=unroll)              # (C, n_idx) = preds[idx]^T, f32
        m = jnp.max(sel, axis=0, keepdims=True)
        z = sel - m
        lse = jnp.log(jnp.sum(jnp.exp(z), axis=0, keepdims=True))
        out_ref[...] = z - lse


def agnostic_forward(x, w0, w1, w2, a_hat, idx, *, alpha=0.1, niter=3,
                     tile_n=None, compute_dtype=jnp.bfloat16,
                     a_is_symmetric=True, vmem_budget_bytes=None):
    """Fused Pallas forward for `agnostic_model`. Returns (len(idx), C) log-probs."""
    N, F = x.shape
    H0 = w0.shape[1]
    H1 = w1.shape[1]
    C = w2.shape[1]
    n_idx = int(idx.shape[0])
    assert niter >= 0

    cs = np.dtype(compute_dtype).itemsize

    # ---- VMEM budget: ~75% of detected physical (v7x: 48 of 64 MiB; v6e: 96 of 128).
    if vmem_budget_bytes is None:
        try:
            phys = int(pltpu.get_tpu_info().vmem_capacity_bytes)
        except Exception:
            phys = 64 * 1024 * 1024            # conservative fallback (v7x-safe)
        vmem_budget_bytes = (phys * 3) // 4

    # ---- tile_n: largest node tile that fits the budget; single tile when small.
    c_sub = 8 if cs == 4 else 16
    c_pad_c = max(c_sub, -(-C // c_sub) * c_sub)            # sublane padding, compute dtype
    c_pad_f = max(8, -(-C // 8) * 8)                        # sublane padding, f32
    scratch_bytes = N * (2 * c_pad_c * cs + c_pad_f * 4)    # preds ping/pong + alpha*local
    weight_bytes = 2 * cs * (H0 * F + H1 * H0 + C * H1)     # default-double-buffered weights
    per_col_bytes = 2 * cs * (N + F)                        # double-buffered A column + x column
    if tile_n is None:
        avail = vmem_budget_bytes - scratch_bytes - weight_bytes - (1 << 20)
        max_cols = max(avail // per_col_bytes, 0)
        if N <= 1024 or max_cols >= N:
            tile_n = N                                      # single tile: grid ~ (niter+1,)
        else:
            cand = min((max_cols // 128) * 128, (N // 128) * 128)
            while cand >= 128 and N % cand != 0:
                cand -= 128
            tile_n = cand if cand >= 128 else 128
    tile_n = int(tile_n)
    assert N % tile_n == 0, "tile_n must divide N (pad the graph if necessary)"
    n_tiles = N // tile_n
    if n_tiles > 1:
        assert tile_n % 128 == 0, "when tiled, tile_n must be a multiple of 128"

    # ---- layout plumbing: cheap one-time transposes/casts of x & weights.  The hot
    # niter*N^2 A stream is passed through untouched unless a dtype cast is needed.
    xt = x.T.astype(compute_dtype)                          # (F, N)
    w0t = w0.T.astype(compute_dtype)                        # (H0, F)
    w1t = w1.T.astype(compute_dtype)                        # (H1, H0)
    w2t = w2.T.astype(compute_dtype)                        # (C, H1)
    a_c = a_hat if a_is_symmetric else a_hat.T
    if a_c.dtype != compute_dtype:
        a_c = a_c.astype(compute_dtype)                     # once, outside the hot path
    idx2d = idx.reshape(1, n_idx).astype(jnp.int32)

    kernel = functools.partial(
        _agnostic_kernel, alpha=float(alpha), niter=int(niter),
        tile_n=tile_n, n_tiles=int(n_tiles), n_idx=n_idx, nclasses=int(C),
        compute_dtype=compute_dtype)

    grid = (niter + 1, n_tiles)          # (phase, node tile); both sequential on one TC

    xt_spec = pl.BlockSpec((F, tile_n), lambda p, i: (0, jnp.where(p == 0, i, 0)))
    w0t_spec = pl.BlockSpec((H0, F), lambda p, i: (0, 0))   # resident
    w1t_spec = pl.BlockSpec((H1, H0), lambda p, i: (0, 0))  # resident
    w2t_spec = pl.BlockSpec((C, H1), lambda p, i: (0, 0))   # resident
    a_spec = pl.BlockSpec((N, tile_n), lambda p, i: (0, jnp.where(p == 0, 0, i)))
    idx_spec = pl.BlockSpec((1, n_idx), lambda p, i: (0, 0))
    out_spec = pl.BlockSpec((C, n_idx), lambda p, i: (0, 0))

    out_t = pl.pallas_call(
        kernel,
        out_shape=jax.ShapeDtypeStruct((C, n_idx), jnp.float32),
        grid_spec=pltpu.PrefetchScalarGridSpec(
            num_scalar_prefetch=0,
            grid=grid,
            in_specs=[xt_spec, w0t_spec, w1t_spec, w2t_spec, a_spec, idx_spec],
            out_specs=out_spec,
            scratch_shapes=[
                pltpu.VMEM((n_tiles, C, tile_n), compute_dtype),  # preds ping (transposed)
                pltpu.VMEM((n_tiles, C, tile_n), compute_dtype),  # preds pong (transposed)
                pltpu.VMEM((n_tiles, C, tile_n), jnp.float32),    # alpha * local (f32)
            ],
        ),
        compiler_params=pltpu.CompilerParams(
            dimension_semantics=("arbitrary", "arbitrary"),
            vmem_limit_bytes=int(vmem_budget_bytes),
        ),
    )(xt, w0t, w1t, w2t, a_c, idx2d)

    return out_t.T                        # (n_idx, C) log-probabilities


def _reference_forward(x, w0, w1, w2, a_hat, idx, *, alpha=0.1, niter=3):
    """Pure-JAX, module-faithful reference for correctness checking."""
    h = jax.nn.relu(x @ w0)
    h = jax.nn.relu(h @ w1)
    local = h @ w2
    preds = local
    for _ in range(niter):
        preds = (1.0 - alpha) * (a_hat @ preds) + alpha * local
    return jax.nn.log_softmax(preds[idx], axis=-1)


if __name__ == "__main__":
    # ---- deterministic synthetic params / inputs ---------------------------
    key = jax.random.PRNGKey(0)
    k_x, k_w0, k_w1, k_w2, k_adj = jax.random.split(key, 5)

    N = 256           # number of nodes
    F = 32            # nfeatures
    HIDDEN = [32, 32] # hiddenunits
    C = 8             # nclasses
    ALPHA = 0.1
    NITER = 3

    x = jax.random.normal(k_x, (N, F), dtype=jnp.float32)

    # Linear weights stored as (in, out); bias=False in the module.
    w0 = jax.random.normal(k_w0, (F, HIDDEN[0]), dtype=jnp.float32) * (1.0 / F ** 0.5)
    w1 = jax.random.normal(k_w1, (HIDDEN[0], HIDDEN[1]), dtype=jnp.float32) * (1.0 / HIDDEN[0] ** 0.5)
    w2 = jax.random.normal(k_w2, (HIDDEN[1], C), dtype=jnp.float32) * (1.0 / HIDDEN[1] ** 0.5)

    # Symmetric-normalized adjacency with self-loops (PPRGo-style propagation).
    adj_rand = (jax.random.uniform(k_adj, (N, N)) < 0.1).astype(jnp.float32)
    adj = jnp.maximum(adj_rand, adj_rand.T) + jnp.eye(N, dtype=jnp.float32)
    deg = jnp.sum(adj, axis=1)
    d_inv_sqrt = 1.0 / jnp.sqrt(deg)
    a_hat = adj * d_inv_sqrt[:, None] * d_inv_sqrt[None, :]

    idx = jnp.array([0, 5, 17, 42, 63, 100, 200, 255], dtype=jnp.int32)

    ref = _reference_forward(x, w0, w1, w2, a_hat, idx, alpha=ALPHA, niter=NITER)

    # ---- f32 compute path (A streamed un-cast, no wrapper N^2 pass) ---------
    out_f32 = agnostic_forward(x, w0, w1, w2, a_hat, idx, alpha=ALPHA, niter=NITER,
                               compute_dtype=jnp.float32)
    out_f32 = jax.block_until_ready(out_f32)
    assert out_f32.shape == (idx.shape[0], C)
    # Tolerance covers TPU default matmul precision (use precision=HIGHEST on the
    # dots instead if bit-faithfulness to the PyTorch model matters).
    assert jnp.allclose(out_f32, ref, atol=3e-2, rtol=3e-2), "f32 mismatch vs reference"
    assert jnp.allclose(jnp.sum(jnp.exp(out_f32), axis=-1), 1.0, atol=1e-4)

    # ---- bf16 compute path (default; f32 accumulation), looser tolerance ----
    out_bf16 = agnostic_forward(x, w0, w1, w2, a_hat, idx, alpha=ALPHA, niter=NITER,
                                compute_dtype=jnp.bfloat16)
    out_bf16 = jax.block_until_ready(out_bf16)
    assert out_bf16.shape == (idx.shape[0], C)
    assert jnp.allclose(out_bf16, ref, atol=0.25, rtol=0.1), "bf16 mismatch vs reference"
    assert jnp.allclose(jnp.sum(jnp.exp(out_bf16), axis=-1), 1.0, atol=1e-3)

    print("KERNEL_OK")
</pallas_src>

<mosaic_0001>
module attributes {stable_mosaic.version = 11 : i64} {
  func.func @_agnostic_kernel(%arg0: i32, %arg1: i32, %arg2: memref<32x256xf32, #tpu.memory_space<vmem>>, %arg3: memref<32x32xf32, #tpu.memory_space<vmem>>, %arg4: memref<32x32xf32, #tpu.memory_space<vmem>>, %arg5: memref<8x32xf32, #tpu.memory_space<vmem>>, %arg6: memref<256x256xf32, #tpu.memory_space<vmem>>, %arg7: memref<1x8xi32, #tpu.memory_space<vmem>>, %arg8: memref<8x8xf32, #tpu.memory_space<vmem>>, %arg9: memref<1x8x256xf32, #tpu.memory_space<vmem>>, %arg10: memref<1x8x256xf32, #tpu.memory_space<vmem>>, %arg11: memref<1x8x256xf32, #tpu.memory_space<vmem>>) attributes {dimension_semantics = [#tpu.dimension_semantics<arbitrary>, #tpu.dimension_semantics<arbitrary>], iteration_bounds = array<i64: 4, 1>, scalar_prefetch = 0 : i64, scratch_operands = 3 : i64, tpu.core_type = #tpu.core_type<tc>, window_params = [{transform_indices = @transform_0, window_bounds = array<i64: 32, 256>}, {pipeline_mode = #tpu.pipeline_mode<synchronous>, transform_indices = @transform_1, window_bounds = array<i64: 32, 32>}, {pipeline_mode = #tpu.pipeline_mode<synchronous>, transform_indices = @transform_2, window_bounds = array<i64: 32, 32>}, {pipeline_mode = #tpu.pipeline_mode<synchronous>, transform_indices = @transform_3, window_bounds = array<i64: 8, 32>}, {transform_indices = @transform_4, window_bounds = array<i64: 256, 256>}, {pipeline_mode = #tpu.pipeline_mode<synchronous>, transform_indices = @transform_5, window_bounds = array<i64: 1, 8>}, {pipeline_mode = #tpu.pipeline_mode<synchronous>, transform_indices = @transform_6, window_bounds = array<i64: 8, 8>}]} {
    %c0_i32 = arith.constant 0 : i32
    %0 = arith.cmpi eq, %arg0, %c0_i32 : i32
    %1 = arith.extui %0 : i1 to i32
    %c0_i32_0 = arith.constant 0 : i32
    %2 = arith.cmpi ne, %1, %c0_i32_0 : i32
    scf.if %2 {
      %c0 = arith.constant 0 : index
      %c0_19 = arith.constant 0 : index
      %38 = vector.load %arg3[%c0, %c0_19] : memref<32x32xf32, #tpu.memory_space<vmem>>, vector<32x32xf32>
      %c0_20 = arith.constant 0 : index
      %c0_21 = arith.constant 0 : index
      %39 = vector.load %arg2[%c0_20, %c0_21] : memref<32x256xf32, #tpu.memory_space<vmem>>, vector<32x256xf32>
      %cst = arith.constant dense<0.000000e+00> : vector<32x256xf32>
      %40 = tpu.matmul %38, %39, %cst {dimension_numbers = #tpu.dot_dimension_numbers<[1], [0], [0], [1], [0, 0, 1, 1], [], []>} : vector<32x32xf32>, vector<32x256xf32>, vector<32x256xf32> -> vector<32x256xf32>
      %cst_22 = arith.constant 0.000000e+00 : f32
      %41 = vector.broadcast %cst_22 : f32 to vector<32x256xf32>
      %42 = arith.maximumf %40, %41 : vector<32x256xf32>
      %c0_23 = arith.constant 0 : index
      %c0_24 = arith.constant 0 : index
      %43 = vector.load %arg4[%c0_23, %c0_24] : memref<32x32xf32, #tpu.memory_space<vmem>>, vector<32x32xf32>
      %cst_25 = arith.constant dense<0.000000e+00> : vector<32x256xf32>
      %44 = tpu.matmul %43, %42, %cst_25 {dimension_numbers = #tpu.dot_dimension_numbers<[1], [0], [0], [1], [0, 0, 1, 1], [], []>} : vector<32x32xf32>, vector<32x256xf32>, vector<32x256xf32> -> vector<32x256xf32>
      %cst_26 = arith.constant 0.000000e+00 : f32
      %45 = vector.broadcast %cst_26 : f32 to vector<32x256xf32>
      %46 = arith.maximumf %44, %45 : vector<32x256xf32>
      %c0_27 = arith.constant 0 : index
      %c0_28 = arith.constant 0 : index
      %47 = vector.load %arg5[%c0_27, %c0_28] : memref<8x32xf32, #tpu.memory_space<vmem>>, vector<8x32xf32>
      %cst_29 = arith.constant dense<0.000000e+00> : vector<8x256xf32>
      %48 = tpu.matmul %47, %46, %cst_29 {dimension_numbers = #tpu.dot_dimension_numbers<[1], [0], [0], [1], [0, 0, 1, 1], [], []>} : vector<8x32xf32>, vector<32x256xf32>, vector<8x256xf32> -> vector<8x256xf32>
      %49 = arith.index_cast %arg1 : i32 to index
      %c0_30 = arith.constant 0 : index
      %c0_31 = arith.constant 0 : index
      %50 = vector.load %arg9[%49, %c0_30, %c0_31] : memref<1x8x256xf32, #tpu.memory_space<vmem>>, vector<1x8x256xf32>
      %51 = vector.shape_cast %50 : vector<1x8x256xf32> to vector<8x256xf32>
      %52 = vector.shape_cast %48 : vector<8x256xf32> to vector<1x8x256xf32>
      tpu.vector_store %arg9[%49, %c0_30, %c0_31], %52 {strides = array<i32>} : memref<1x8x256xf32, #tpu.memory_space<vmem>>, vector<1x8x256xf32>,
      %cst_32 = arith.constant 1.000000e-01 : f32
      %53 = vector.broadcast %cst_32 : f32 to vector<8x256xf32>
      %54 = arith.mulf %53, %48 : vector<8x256xf32>
      %55 = arith.index_cast %arg1 : i32 to index
      %c0_33 = arith.constant 0 : index
      %c0_34 = arith.constant 0 : index
      %56 = vector.load %arg11[%55, %c0_33, %c0_34] : memref<1x8x256xf32, #tpu.memory_space<vmem>>, vector<1x8x256xf32>
      %57 = vector.shape_cast %56 : vector<1x8x256xf32> to vector<8x256xf32>
      %58 = vector.shape_cast %54 : vector<8x256xf32> to vector<1x8x256xf32>
      tpu.vector_store %arg11[%55, %c0_33, %c0_34], %58 {strides = array<i32>} : memref<1x8x256xf32, #tpu.memory_space<vmem>>, vector<1x8x256xf32>,
    } else {
    }
    %c0_i32_1 = arith.constant 0 : i32
    %3 = arith.cmpi sgt, %arg0, %c0_i32_1 : i32
    %c2_i32 = arith.constant 2 : i32
    %c0_i32_2 = arith.constant 0 : i32
    %4 = arith.cmpi eq, %c2_i32, %c0_i32_2 : i32
    %c1_i32 = arith.constant 1 : i32
    %5 = arith.select %4, %c1_i32, %c2_i32 : i32
    %6 = arith.remsi %arg0, %5 : i32
    %c0_i32_3 = arith.constant 0 : i32
    %7 = arith.cmpi ne, %6, %c0_i32_3 : i32
    %c0_i32_4 = arith.constant 0 : i32
    %8 = arith.cmpi slt, %6, %c0_i32_4 : i32
    %c0_i32_5 = arith.constant 0 : i32
    %9 = arith.cmpi slt, %5, %c0_i32_5 : i32
    %10 = arith.xori %8, %9 : i1
    %11 = arith.andi %10, %7 : i1
    %12 = arith.addi %6, %5 : i32
    %13 = arith.select %11, %12, %6 : i32
    %c1_i32_6 = arith.constant 1 : i32
    %14 = arith.cmpi eq, %13, %c1_i32_6 : i32
    %15 = arith.andi %3, %14 : i1
    %16 = arith.extui %15 : i1 to i32
    %c0_i32_7 = arith.constant 0 : i32
    %17 = arith.cmpi ne, %16, %c0_i32_7 : i32
    scf.if %17 {
      %cst = arith.constant 0.000000e+00 : f32
      %38 = vector.broadcast %cst : f32 to vector<8x256xf32>
      %c0_i32_19 = arith.constant 0 : i32
      %c256_i32 = arith.constant 256 : i32
      %39 = arith.muli %c0_i32_19, %c256_i32 : i32
      %40 = tpu.assume_multiple %39, 256 : i32
      %41 = arith.index_cast %40 : i32 to index
      %c0 = arith.constant 0 : index
      %42 = vector.load %arg6[%41, %c0] : memref<256x256xf32, #tpu.memory_space<vmem>>, vector<256x256xf32>
      %43 = arith.index_cast %c0_i32_19 : i32 to index
      %c0_20 = arith.constant 0 : index
      %c0_21 = arith.constant 0 : index
      %44 = vector.load %arg9[%43, %c0_20, %c0_21] : memref<1x8x256xf32, #tpu.memory_space<vmem>>, vector<1x8x256xf32>
      %45 = vector.shape_cast %44 : vector<1x8x256xf32> to vector<8x256xf32>
      %cst_22 = arith.constant dense<0.000000e+00> : vector<8x256xf32>
      %46 = tpu.matmul %45, %42, %cst_22 {dimension_numbers = #tpu.dot_dimension_numbers<[1], [0], [0], [1], [0, 0, 1, 1], [], []>} : vector<8x256xf32>, vector<256x256xf32>, vector<8x256xf32> -> vector<8x256xf32>
      %47 = arith.addf %38, %46 : vector<8x256xf32>
      %c1_i32_23 = arith.constant 1 : i32
      %cst_24 = arith.constant 0.899999976 : f32
      %48 = vector.broadcast %cst_24 : f32 to vector<8x256xf32>
      %49 = arith.mulf %48, %47 : vector<8x256xf32>
      %50 = arith.index_cast %arg1 : i32 to index
      %c0_25 = arith.constant 0 : index
      %c0_26 = arith.constant 0 : index
      %51 = vector.load %arg11[%50, %c0_25, %c0_26] : memref<1x8x256xf32, #tpu.memory_space<vmem>>, vector<1x8x256xf32>
      %52 = vector.shape_cast %51 : vector<1x8x256xf32> to vector<8x256xf32>
      %53 = arith.addf %49, %52 : vector<8x256xf32>
      %54 = arith.index_cast %arg1 : i32 to index
      %c0_27 = arith.constant 0 : index
      %c0_28 = arith.constant 0 : index
      %55 = vector.load %arg10[%54, %c0_27, %c0_28] : memref<1x8x256xf32, #tpu.memory_space<vmem>>, vector<1x8x256xf32>
      %56 = vector.shape_cast %55 : vector<1x8x256xf32> to vector<8x256xf32>
      %57 = vector.shape_cast %53 : vector<8x256xf32> to vector<1x8x256xf32>
      tpu.vector_store %arg10[%54, %c0_27, %c0_28], %57 {strides = array<i32>} : memref<1x8x256xf32, #tpu.memory_space<vmem>>, vector<1x8x256xf32>,
    } else {
    }
    %c0_i32_8 = arith.constant 0 : i32
    %18 = arith.cmpi sgt, %arg0, %c0_i32_8 : i32
    %c2_i32_9 = arith.constant 2 : i32
    %c0_i32_10 = arith.constant 0 : i32
    %19 = arith.cmpi eq, %c2_i32_9, %c0_i32_10 : i32
    %c1_i32_11 = arith.constant 1 : i32
    %20 = arith.select %19, %c1_i32_11, %c2_i32_9 : i32
    %21 = arith.remsi %arg0, %20 : i32
    %c0_i32_12 = arith.constant 0 : i32
    %22 = arith.cmpi ne, %21, %c0_i32_12 : i32
    %c0_i32_13 = arith.constant 0 : i32
    %23 = arith.cmpi slt, %21, %c0_i32_13 : i32
    %c0_i32_14 = arith.constant 0 : i32
    %24 = arith.cmpi slt, %20, %c0_i32_14 : i32
    %25 = arith.xori %23, %24 : i1
    %26 = arith.andi %25, %22 : i1
    %27 = arith.addi %21, %20 : i32
    %28 = arith.select %26, %27, %21 : i32
    %c0_i32_15 = arith.constant 0 : i32
    %29 = arith.cmpi eq, %28, %c0_i32_15 : i32
    %30 = arith.andi %18, %29 : i1
    %31 = arith.extui %30 : i1 to i32
    %c0_i32_16 = arith.constant 0 : i32
    %32 = arith.cmpi ne, %31, %c0_i32_16 : i32
    scf.if %32 {
      %cst = arith.constant 0.000000e+00 : f32
      %38 = vector.broadcast %cst : f32 to vector<8x256xf32>
      %c0_i32_19 = arith.constant 0 : i32
      %c256_i32 = arith.constant 256 : i32
      %39 = arith.muli %c0_i32_19, %c256_i32 : i32
      %40 = tpu.assume_multiple %39, 256 : i32
      %41 = arith.index_cast %40 : i32 to index
      %c0 = arith.constant 0 : index
      %42 = vector.load %arg6[%41, %c0] : memref<256x256xf32, #tpu.memory_space<vmem>>, vector<256x256xf32>
      %43 = arith.index_cast %c0_i32_19 : i32 to index
      %c0_20 = arith.constant 0 : index
      %c0_21 = arith.constant 0 : index
      %44 = vector.load %arg10[%43, %c0_20, %c0_21] : memref<1x8x256xf32, #tpu.memory_space<vmem>>, vector<1x8x256xf32>
      %45 = vector.shape_cast %44 : vector<1x8x256xf32> to vector<8x256xf32>
      %cst_22 = arith.constant dense<0.000000e+00> : vector<8x256xf32>
      %46 = tpu.matmul %45, %42, %cst_22 {dimension_numbers = #tpu.dot_dimension_numbers<[1], [0], [0], [1], [0, 0, 1, 1], [], []>} : vector<8x256xf32>, vector<256x256xf32>, vector<8x256xf32> -> vector<8x256xf32>
      %47 = arith.addf %38, %46 : vector<8x256xf32>
      %c1_i32_23 = arith.constant 1 : i32
      %cst_24 = arith.constant 0.899999976 : f32
      %48 = vector.broadcast %cst_24 : f32 to vector<8x256xf32>
      %49 = arith.mulf %48, %47 : vector<8x256xf32>
      %50 = arith.index_cast %arg1 : i32 to index
      %c0_25 = arith.constant 0 : index
      %c0_26 = arith.constant 0 : index
      %51 = vector.load %arg11[%50, %c0_25, %c0_26] : memref<1x8x256xf32, #tpu.memory_space<vmem>>, vector<1x8x256xf32>
      %52 = vector.shape_cast %51 : vector<1x8x256xf32> to vector<8x256xf32>
      %53 = arith.addf %49, %52 : vector<8x256xf32>
      %54 = arith.index_cast %arg1 : i32 to index
      %c0_27 = arith.constant 0 : index
      %c0_28 = arith.constant 0 : index
      %55 = vector.load %arg9[%54, %c0_27, %c0_28] : memref<1x8x256xf32, #tpu.memory_space<vmem>>, vector<1x8x256xf32>
      %56 = vector.shape_cast %55 : vector<1x8x256xf32> to vector<8x256xf32>
      %57 = vector.shape_cast %53 : vector<8x256xf32> to vector<1x8x256xf32>
      tpu.vector_store %arg9[%54, %c0_27, %c0_28], %57 {strides = array<i32>} : memref<1x8x256xf32, #tpu.memory_space<vmem>>, vector<1x8x256xf32>,
    } else {
    }
    %c3_i32 = arith.constant 3 : i32
    %33 = arith.cmpi eq, %arg0, %c3_i32 : i32
    %c0_i32_17 = arith.constant 0 : i32
    %34 = arith.cmpi eq, %arg1, %c0_i32_17 : i32
    %35 = arith.andi %33, %34 : i1
    %36 = arith.extui %35 : i1 to i32
    %c0_i32_18 = arith.constant 0 : i32
    %37 = arith.cmpi ne, %36, %c0_i32_18 : i32
    scf.if %37 {
      %c0 = arith.constant 0 : index
      %c0_19 = arith.constant 0 : index
      %38 = vector.load %arg7[%c0, %c0_19] : memref<1x8xi32, #tpu.memory_space<vmem>>, vector<1x8xi32>
      %cst = arith.constant 0.000000e+00 : f32
      %39 = vector.broadcast %cst : f32 to vector<8x8xf32>
      %c0_i32_20 = arith.constant 0 : i32
      %40 = tpu.iota {dimensions = array<i32: 0>} : vector<256x8xi32>
      %c256_i32 = arith.constant 256 : i32
      %41 = arith.muli %c0_i32_20, %c256_i32 : i32
      %42 = vector.broadcast %41 : i32 to vector<256x8xi32>
      %43 = arith.addi %40, %42 : vector<256x8xi32>
      %44 = vector.broadcast %38 : vector<1x8xi32> to vector<256x8xi32>
      %45 = arith.cmpi eq, %43, %44 : vector<256x8xi32>
      %46 = arith.extui %45 : vector<256x8xi1> to vector<256x8xi32>
      %47 = arith.sitofp %46 : vector<256x8xi32> to vector<256x8xf32>
      %48 = arith.index_cast %c0_i32_20 : i32 to index
      %c0_21 = arith.constant 0 : index
      %c0_22 = arith.constant 0 : index
      %49 = vector.load %arg10[%48, %c0_21, %c0_22] : memref<1x8x256xf32, #tpu.memory_space<vmem>>, vector<1x8x256xf32>
      %50 = vector.shape_cast %49 : vector<1x8x256xf32> to vector<8x256xf32>
      %cst_23 = arith.constant dense<0.000000e+00> : vector<8x8xf32>
      %51 = tpu.matmul %50, %47, %cst_23 {dimension_numbers = #tpu.dot_dimension_numbers<[1], [0], [0], [1], [0, 0, 1, 1], [], []>} : vector<8x256xf32>, vector<256x8xf32>, vector<8x8xf32> -> vector<8x8xf32>
      %52 = arith.addf %39, %51 : vector<8x8xf32>
      %c1_i32_24 = arith.constant 1 : i32
      %cst_25 = arith.constant dense<0xFF800000> : vector<8xf32>
      %53 = vector.multi_reduction <maximumf>, %52, %cst_25 [0] : vector<8x8xf32> to vector<8xf32>
      %54 = vector.shape_cast %53 : vector<8xf32> to vector<1x8xf32>
      %55 = vector.broadcast %54 : vector<1x8xf32> to vector<8x8xf32>
      %56 = arith.subf %52, %55 : vector<8x8xf32>
      %57 = math.exp %56 : vector<8x8xf32>
      %cst_26 = arith.constant dense<0.000000e+00> : vector<8xf32>
      %58 = vector.multi_reduction <add>, %57, %cst_26 [0] : vector<8x8xf32> to vector<8xf32>
      %59 = vector.shape_cast %58 : vector<8xf32> to vector<1x8xf32>
      %60 = math.log %59 : vector<1x8xf32>
      %61 = vector.broadcast %60 : vector<1x8xf32> to vector<8x8xf32>
      %62 = arith.subf %56, %61 : vector<8x8xf32>
      %c0_27 = arith.constant 0 : index
      %c0_28 = arith.constant 0 : index
      %63 = vector.load %arg8[%c0_27, %c0_28] : memref<8x8xf32, #tpu.memory_space<vmem>>, vector<8x8xf32>
      tpu.vector_store %arg8[%c0_27, %c0_28], %62 {strides = array<i32>} : memref<8x8xf32, #tpu.memory_space<vmem>>, vector<8x8xf32>,
    } else {
    }
    return
  }
  func.func @transform_0(%arg0: i32, %arg1: i32) -> (i32, i32) {
    %c0_i32 = arith.constant 0 : i32
    %0 = arith.cmpi eq, %arg0, %c0_i32 : i32
    %c0_i32_0 = arith.constant 0 : i32
    %1 = arith.select %0, %arg1, %c0_i32_0 : i32
    %c0_i32_1 = arith.constant 0 : i32
    %c0_i32_2 = arith.constant 0 : i32
    return %c0_i32_1, %1 : i32, i32
  }
  func.func @transform_1(%arg0: i32, %arg1: i32) -> (i32, i32) {
    %c0_i32 = arith.constant 0 : i32
    %c0_i32_0 = arith.constant 0 : i32
    %c0_i32_1 = arith.constant 0 : i32
    return %c0_i32, %c0_i32_0 : i32, i32
  }
  func.func @transform_2(%arg0: i32, %arg1: i32) -> (i32, i32) {
    %c0_i32 = arith.constant 0 : i32
    %c0_i32_0 = arith.constant 0 : i32
    %c0_i32_1 = arith.constant 0 : i32
    return %c0_i32, %c0_i32_0 : i32, i32
  }
  func.func @transform_3(%arg0: i32, %arg1: i32) -> (i32, i32) {
    %c0_i32 = arith.constant 0 : i32
    %c0_i32_0 = arith.constant 0 : i32
    %c0_i32_1 = arith.constant 0 : i32
    return %c0_i32, %c0_i32_0 : i32, i32
  }
  func.func @transform_4(%arg0: i32, %arg1: i32) -> (i32, i32) {
    %c0_i32 = arith.constant 0 : i32
    %0 = arith.cmpi eq, %arg0, %c0_i32 : i32
    %c0_i32_0 = arith.constant 0 : i32
    %1 = arith.select %0, %c0_i32_0, %arg1 : i32
    %c0_i32_1 = arith.constant 0 : i32
    %c0_i32_2 = arith.constant 0 : i32
    return %c0_i32_1, %1 : i32, i32
  }
  func.func @transform_5(%arg0: i32, %arg1: i32) -> (i32, i32) {
    %c0_i32 = arith.constant 0 : i32
    %c0_i32_0 = arith.constant 0 : i32
    %c0_i32_1 = arith.constant 0 : i32
    return %c0_i32, %c0_i32_0 : i32, i32
  }
  func.func @transform_6(%arg0: i32, %arg1: i32) -> (i32, i32) {
    %c0_i32 = arith.constant 0 : i32
    %c0_i32_0 = arith.constant 0 : i32
    %c0_i32_1 = arith.constant 0 : i32
    return %c0_i32, %c0_i32_0 : i32, i32
  }
}

</mosaic_0001>

<bundles_post_ra>
// kernel: tpu_custom_call.1
= control target key start
LH: loop header
LB: loop body
LE: loop exit
PB: predicated region body
PF: predicated region fallthrough
CT: control target
= control target key end

     0   :  { %11 = vsyncpa [#allocation6], 0  ;;  %s2289_s0 = inlined_call_operand.hbm [shape: f32[32,256], index: 0, kind: input, shape index: {}]   ;;  %s2290_s1 = inlined_call_operand.hbm [shape: f32[32,32], index: 1, kind: input, shape index: {}]   ;;  %s2291_s2 = inlined_call_operand.hbm [shape: f32[32,32], index: 2, kind: input, shape index: {}]   ;;  %s2292_s3 = inlined_call_operand.vmem [shape: f32[8,32], index: 3, kind: input, shape index: {}]   ;;  %s2293_s4 = inlined_call_operand.hbm [shape: f32[256,256], index: 4, kind: input, shape index: {}]   ;;  %s2294_s5 = inlined_call_operand.vmem [shape: s32[1,8], index: 5, kind: input, shape index: {}]   ;;  %s2295_s6 = inlined_call_operand.hbm [shape: f32[8,8], index: 6, kind: output, shape index: {}]  }
   0x1   :  { %13 = vsyncpa [#allocation6 + $0x1], 0 }
   0x2   :  { %14 = vsyncpa [#allocation9], 0 }
   0x3   :  { %15 = vsyncpa [#allocation12], 0 }
   0x4   :  { %17 = vsyncpa [#allocation12 + $0x1], 0 }
   0x5   :  { %18 = vsyncpa [#allocation7], 0  ;;  %s1988_s21 = smov 0   ;;  %s1990_s22 = smov 0  }
   0x6   :  { %s1992_s23 = smov 0  }
   0x7 LB: > { %s1365_s24 = sadd.s32 4294967295, %s1940_s23   ;;  %s36_s25 = sadd.s32 1, %s1936_s22  ;;  %s1940_s23 = sphi %s1992_s23, %s24_s23   ;;  %s1936_s22 = sphi %s1990_s22, %s2308_s22   ;;  %s1932_s21 = sphi %s1988_s21, %s2307_s21  }
   0x8   : > { %p38_p0 = scmp.ge.s32.totalorder %s36_s25, 4  ;;  %p1366_p1 = scmp.ge.s32.totalorder %s1940_s23, 1 }
   0x9   : > { %p206_p2 = scmp.lt.s32.totalorder %s1940_s23, 5  ;;  %p2015_p4 = scmp.eq.s32.totalorder %s1365_s24, 0 }
   0xa   : > { %s2310_s25 = smov (%p38_p0, %s36_s25), 0  ;;  %s1942_s28 = smov [#allocation8]  }
   0xb   : > { %p2009_p3 = pnand %p1366_p1, %p206_p2  ;;  %s218_s29 = sshll.u32 %s1942_s28, 4  ;;  %s219_s29 = int_to_ptr.vmem [resolvable:$true] %s218_s29 }
   0xc   : > { %s2300_s27 = scalar_select %p2015_p4, 1, 0 }
   0xd   : > { %s2299_s26 = scalar_select %p2009_p3, 1, 0 }
   0xe   : > { %p1700_p5 = pneg %p2009_p3  ;;  %s1943_s7 = smov [#allocation10]  }
   0xf   : > { %s231_s8 = sshll.u32 %s1943_s7, 4  ;;  %s1764_s11 = scalar_lea.hbm %s2290_s1, 512  ;;  %s232_s8 = int_to_ptr.vmem [resolvable:$true] %s231_s8 }
  0x10   : > { %p2023_p6 = pnand %p2015_p4, %p1700_p5  ;;  %p1765_p7 = scmp.ne.s32.totalorder %s2290_s1, %s1764_s11 }
  0x11   : > { %p1771_p11 = scmp.lt.u32.totalorder %s1764_s11, %s2290_s1 }
  0x12   : > { %p1766_p8 = pneg %p2023_p6 }
  0x14   : > { %p1767_p9 = pnand %p1766_p8, %p1765_p7 }
  0x16   : > { %p1768_p10 = pneg %p1767_p9 }
  0x18   : > { %p1773_p12 = pnand %p1771_p11, %p1768_p10 }
  0x1a   : > { %1776 = shalt.err (!%p1773_p12)
}
  0x1b   : > { %s1777_s16 = scalar_lea.vmem %s219_s29, 512  ;;  %p1785_p2 = scmp.lt.s32.totalorder %s219_s29, %s219_s29 }
  0x1c   : > { %p1778_p13 = scmp.ne.s32.totalorder %s219_s29, %s1777_s16  ;;  %p1786_p5 = scmp.lt.s32.totalorder %s1777_s16, %s1777_s16 }
  0x1e   : > { %p1780_p0 = pnand %p1778_p13, %p1766_p8  ;;  %p1787_p4 = por %p1786_p5, %p1785_p2 }
  0x20   : > { %p1781_p1 = pneg %p1780_p0 }
  0x22   : > { %p1788_p3 = pnand %p1787_p4, %p1781_p1 }
  0x24   : > { %1791 = shalt.err (!%p1788_p3)
}
  0x25   : > { %s1944_s17 = smov 128   ;;  %s1945_s18 = smov 8  }
  0x26   : > { %1703 = dma.hbm_to_vmem [thread:$0]  (!%p2023_p6), %s2290_s1, 512, %s219_s29, [#allocation9], %s1944_s17, %s1944_s17, %s1945_s18  }
  0x27   : > { %s1792_s9 = scalar_lea.hbm %s2291_s2, 512 }
  0x28   : > { %p1793_p3 = scmp.ne.s32.totalorder %s2291_s2, %s1792_s9  ;;  %p1799_p10 = scmp.lt.u32.totalorder %s1792_s9, %s2291_s2 }
  0x2a   : > { %p1795_p4 = pnand %p1793_p3, %p1766_p8 }
  0x2c   : > { %p1796_p9 = pneg %p1795_p4 }
  0x2e   : > { %p1801_p11 = pnand %p1799_p10, %p1796_p9 }
  0x30   : > { %1804 = shalt.err (!%p1801_p11)
}
  0x31   : > { %s1805_s29 = scalar_lea.vmem %s232_s8, 512  ;;  %p1813_p1 = scmp.lt.s32.totalorder %s232_s8, %s232_s8 }
  0x32   : > { %p1806_p12 = scmp.ne.s32.totalorder %s232_s8, %s1805_s29  ;;  %p1814_p2 = scmp.lt.s32.totalorder %s1805_s29, %s1805_s29 }
  0x34   : > { %p1808_p13 = pnand %p1806_p12, %p1766_p8  ;;  %p1815_p5 = por %p1814_p2, %p1813_p1 }
  0x36   : > { %p1809_p0 = pneg %p1808_p13 }
  0x38   : > { %p1816_p7 = pnand %p1815_p5, %p1809_p0 }
  0x3a   : > { %1819 = shalt.err (!%p1816_p7)
}
  0x3b   : > { %1706 = dma.hbm_to_vmem [thread:$0]  (!%p2023_p6), %s2291_s2, 512, %s232_s8, [#allocation9], %s1944_s17, %s1944_s17, %s1945_s18  }
  0x3c   : > { %p1717_p3 = scmp.eq.s32.totalorder %s1940_s23, 0  ;;  %s1946_s16 = smov [#allocation5]  }
  0x3d   : > { %s264_s19 = sshll.u32 %s1946_s16, 4  ;;  %p2302_p4 = scmp.lt.s32.totalorder %s1940_s23, 4  ;;  %s265_s19 = int_to_ptr.vmem [resolvable:$true] %s264_s19 }
  0x3e   : > { %s1947_s28 = smov [#allocation11]   ;;  %s1820_s10 = scalar_lea.hbm %s2289_s0, 1024 }
  0x3f   : > { %p2073_p8 = pnand %p1717_p3, %p2302_p4  ;;  %s287_s7 = sshll.u32 %s1947_s28, 4  ;;  %s288_s7 = int_to_ptr.vmem [resolvable:$true] %s287_s7 }
  0x40   : > { %p1821_p6 = scmp.ne.s32.totalorder %s2289_s0, %s1820_s10  ;;  %p1827_p11 = scmp.lt.u32.totalorder %s1820_s10, %s2289_s0 }
  0x41   : > { %p1822_p7 = pneg %p2073_p8 }
  0x43   : > { %p1823_p9 = pnand %p1822_p7, %p1821_p6 }
  0x45   : > { %p1824_p10 = pneg %p1823_p9 }
  0x47   : > { %p1829_p12 = pnand %p1827_p11, %p1824_p10 }
  0x49   : > { %1832 = shalt.err (!%p1829_p12)
}
  0x4a   : > { %s1833_s18 = scalar_lea.vmem %s265_s19, 1024  ;;  %s1840_s13 = scalar_lea.vmem %s265_s19, 2048 }
  0x4b   : > { %p1834_p13 = scmp.ne.s32.totalorder %s265_s19, %s1833_s18  ;;  %p1841_p2 = scmp.lt.s32.totalorder %s265_s19, %s265_s19 }
  0x4c   : > { %p1842_p5 = scmp.lt.s32.totalorder %s1840_s13, %s1833_s18 }
  0x4d   : > { %p1836_p0 = pnand %p1834_p13, %p1822_p7 }
  0x4e   : > { %p1843_p3 = por %p1842_p5, %p1841_p2 }
  0x4f   : > { %p1837_p1 = pneg %p1836_p0 }
  0x51   : > { %p1844_p4 = pnand %p1843_p3, %p1837_p1 }
  0x53   : > { %1847 = shalt.err (!%p1844_p4)
}
  0x54   : > { %s1948_s29 = smov 256   ;;  %s1949_s14 = smov 16  }
  0x55   : > { %1710 = dma.hbm_to_vmem [thread:$0]  (!%p2073_p8), %s2289_s0, 1024, %s265_s19, [#allocation6], %s1948_s29, %s1948_s29, %s1949_s14  }
  0x56   : > { %s1848_s9 = scalar_lea.hbm %s2293_s4, 8192 }
  0x57   : > { %p1849_p6 = scmp.ne.s32.totalorder %s2293_s4, %s1848_s9  ;;  %p1855_p11 = scmp.lt.u32.totalorder %s1848_s9, %s2293_s4 }
  0x59   : > { %p1851_p9 = pnand %p1849_p6, %p1822_p7 }
  0x5b   : > { %p1852_p10 = pneg %p1851_p9 }
  0x5d   : > { %p1857_p12 = pnand %p1855_p11, %p1852_p10 }
  0x5f   : > { %1860 = shalt.err (!%p1857_p12)
}
  0x60   : > { %s1861_s19 = scalar_lea.vmem %s288_s7, 8192  ;;  %s1868_s17 = scalar_lea.vmem %s288_s7, 16384 }
  0x61   : > { %p1862_p13 = scmp.ne.s32.totalorder %s288_s7, %s1861_s19  ;;  %p1869_p2 = scmp.lt.s32.totalorder %s288_s7, %s288_s7 }
  0x62   : > { %p1870_p5 = scmp.lt.s32.totalorder %s1868_s17, %s1861_s19 }
  0x63   : > { %p1864_p0 = pnand %p1862_p13, %p1822_p7 }
  0x64   : > { %p1871_p3 = por %p1870_p5, %p1869_p2 }
  0x65   : > { %p1865_p1 = pneg %p1864_p0 }
  0x67   : > { %p1872_p4 = pnand %p1871_p3, %p1865_p1 }
  0x69   : > { %1875 = shalt.err (!%p1872_p4)
}
  0x6a   : > { %1713 = dma.hbm_to_vmem [thread:$0]  (!%p2073_p8), %s2293_s4, 8192, %s288_s7, [#allocation12], %s1948_s29, %s1948_s29, %s1949_s14  }
  0x6b   : > { %p2304_p6 = scmp.ne.s32.totalorder %s2299_s26, 0 }
  0x6c   : > { %p2305_p9 = scmp.ne.s32.totalorder (!%p2304_p6), %s2300_s27, 0 }
  0x6d   : > { %299 = sbr.rel (%p2304_p6) target bundleno = 1737 (0x6c9), region = 44 }
  0x74   : > { %1915 = dma.done.wait (%p2305_p9), [#allocation6], 1024  }
  0x75   : > { %1917 = vsyncadd (%p2305_p9), [#allocation6], 4294966272 }
  0x76   : > { %1919 = dma.done.wait (%p2305_p9), [#allocation9], 1024  }
  0x77   : > { %1921 = vsyncadd (%p2305_p9), [#allocation9], 4294966272 }
  0x78   : > { %1923 = dma.done.wait (%p2305_p9), [#allocation12], 8192  }
  0x79   : > { %1925 = vsyncadd (%p2305_p9), [#allocation12], 4294959104  ;;  %p1377_p8 = scmp.ne.s32.totalorder %s1932_s21, 0 }
  0x7a   : > { %v366_v0 = vld [vmem:[#allocation5 + $0x8] sm:$0xff] (!%p1377_p8)  ;;  %v368_v1 = vld [vmem:[#allocation5 + $0x18] sm:$0xff] (!%p1377_p8)  ;;  %v365_v2 = vld [vmem:[#allocation5] sm:$0xff] (!%p1377_p8)  ;;  %v1950_v7 = vmov (!%p1377_p8), 0.0   ;;  %vm373_vm0 = vcmask (!%p1377_p8), 261120  }
  0x7b   : > { %360 = sbr.rel (%p1377_p8) target bundleno = 815 (0x32f), region = 64  ;;  %v1496_v3 = vpack.c.bf16 (!%p1377_p8), %v368_v1, %v366_v0  ;;  %v367_v4 = vld [vmem:[#allocation5 + $0x10] sm:$0xff] (!%p1377_p8)  ;;  %v370_v5 = vld [vmem:[#allocation5 + $0x28] sm:$0xff] (!%p1377_p8)  ;;  %v372_v6 = vld [vmem:[#allocation5 + $0x38] sm:$0xff] (!%p1377_p8)  ;;  %450 = vmatprep.mubr.f32.mxu0 (!%p1377_p8), %v1950_v7  ;;  %563 = vmatprep.mubr.f32.mxu1 (!%p1377_p8), %v1950_v7 }
  0x7c   : > { %v1498_v8 = vpack.c.bf16 (!%p1377_p8), %v367_v4, %v365_v2  ;;  %v1500_v9 = vpack.c.bf16 (!%p1377_p8), %v372_v6, %v370_v5  ;;  %v369_v10 = vld [vmem:[#allocation5 + $0x20] sm:$0xff] (!%p1377_p8)  ;;  %v371_v11 = vld [vmem:[#allocation5 + $0x30] sm:$0xff] (!%p1377_p8)  ;;  %v362_v14 = vld [vmem:[#allocation8 + $0x8] sm:$0xff] (!%p1377_p8) }
  0x7d   : > { %1497 = vmatprep.subr.bf16.mxu0 (!%p1377_p8), %v1496_v3  ;;  %v1502_v12 = vpack.c.bf16 (!%p1377_p8), %v371_v11, %v369_v10  ;;  %v361_v13 = vld [vmem:[#allocation8] sm:$0xff] (!%p1377_p8)  ;;  %v363_v15 = vld [vmem:[#allocation8 + $0x10] sm:$0xff] (!%p1377_p8)  ;;  %v364_v16 = vld [vmem:[#allocation8 + $0x18] sm:$0xff] (!%p1377_p8) }
  0x7e   : > { %1499 = vmatpush1.bf16.msra.mxu0 (!%p1377_p8), %v1498_v8  ;;  %v483_v37 = vld [vmem:[#allocation10] sm:$0xff] (!%p1377_p8)  ;;  %v484_v38 = vld [vmem:[#allocation10 + $0x8] sm:$0xff] (!%p1377_p8)  ;;  %v485_v39 = vld [vmem:[#allocation10 + $0x10] sm:$0xff] (!%p1377_p8) }
  0x7f   : > { %1501 = vmatprep.subr.bf16.mxu0 (!%p1377_p8), %v1500_v9  ;;  %v486_v40 = vld [vmem:[#allocation10 + $0x18] sm:$0xff] (!%p1377_p8)  ;;  %v596_v61 = vld [vmem:[%s2292_s3] sm:$0xff] (!%p1377_p8) }
  0x82   : > { %1503 = vmatpush1.bf16.msra.mxu0 %v1502_v12 }
  0x85   : > { %1378 = vmatmul.mubr.msk.f32.vlgmr.msra.gmra.mrb[0].mxu0 %vm373_vm0, %v361_v13 }
  0x86   : > { %456 = vmatprep.mubr.f32.mxu0 %v1950_v7 }
  0x89   : > { %1379 = vmatmul.mubr.msk.f32.gmra.mrb[2].mxu0 %vm373_vm0, %v362_v14 }
  0x8a   : > { %462 = vmatprep.mubr.f32.mxu0 %v1950_v7 }
  0x8d   : > { %1380 = vmatmul.mubr.msk.f32.gmra.mrb[4].mxu0 %vm373_vm0, %v363_v15 }
  0x8e   : > { %468 = vmatprep.mubr.f32.mxu0 %v1950_v7 }
  0x91   : > { %1381 = vmatmul.mubr.msk.f32.gmra.mrb[6].mxu0 %vm373_vm0, %v364_v16 }
  0x92   : > { %664 = vmatprep.mubr.f32.mxu0 %v1950_v7 }
 0x158   : > { %v452_v17 = vpop.f32.mrb[0].mxu0 }
 0x159   : > { %v454_v18 = vpop.f32.mrb[1].mxu0  ;;  %v475_v20 = vmax.f32 %v452_v17, 0.0 }
 0x15a   : > { %v476_v23 = vmax.f32 %v454_v18, 0.0 }
 0x15c   : > { %v458_v19 = vpop.f32.mrb[2].mxu0 }
 0x15d   : > { %v477_v21 = vmax.f32 %v458_v19, 0.0  ;;  %v460_v22 = vpop.f32.mrb[3].mxu0 }
 0x15e   : > { %v478_v24 = vmax.f32 %v460_v22, 0.0 }
 0x15f   : > { %v1506_v25 = vpack.c.bf16 %v477_v21, %v475_v20 }
 0x160   : > { %v464_v26 = vpop.f32.mrb[4].mxu0  ;;  %v1504_v27 = vpack.c.bf16 %v478_v24, %v476_v23 }
 0x161   : > { %v466_v28 = vpop.f32.mrb[5].mxu0  ;;  %v479_v30 = vmax.f32 %v464_v26, 0.0 }
 0x162   : > { %1505 = vmatprep.subr.bf16.mxu1 %v1504_v27  ;;  %v480_v33 = vmax.f32 %v466_v28, 0.0 }
 0x163   : > { %1507 = vmatpush1.bf16.msra.mxu1 %v1506_v25 }
 0x164   : > { %v470_v29 = vpop.f32.mrb[6].mxu0 }
 0x165   : > { %v481_v31 = vmax.f32 %v470_v29, 0.0  ;;  %v472_v32 = vpop.f32.mrb[7].mxu0 }
 0x166   : > { %v482_v34 = vmax.f32 %v472_v32, 0.0 }
 0x167   : > { %v1510_v35 = vpack.c.bf16 %v481_v31, %v479_v30 }
 0x168   : > { %v1508_v36 = vpack.c.bf16 %v482_v34, %v480_v33 }
 0x16a   : > { %1509 = vmatprep.subr.bf16.mxu1 %v1508_v36 }
 0x16b   : > { %1511 = vmatpush1.bf16.msra.mxu1 %v1510_v35 }
 0x16e   : > { %1382 = vmatmul.mubr.msk.f32.vlgmr.msra.gmra.mrb[0].mxu1 %vm373_vm0, %v483_v37 }
 0x16f   : > { %569 = vmatprep.mubr.f32.mxu1 %v1950_v7 }
 0x172   : > { %1383 = vmatmul.mubr.msk.f32.gmra.mrb[2].mxu1 %vm373_vm0, %v484_v38 }
 0x173   : > { %575 = vmatprep.mubr.f32.mxu1 %v1950_v7 }
 0x176   : > { %1384 = vmatmul.mubr.msk.f32.gmra.mrb[4].mxu1 %vm373_vm0, %v485_v39 }
 0x177   : > { %581 = vmatprep.mubr.f32.mxu1 %v1950_v7 }
 0x17a   : > { %1385 = vmatmul.mubr.msk.f32.gmra.mrb[6].mxu1 %vm373_vm0, %v486_v40 }
 0x241   : > { %v565_v41 = vpop.f32.mrb[0].mxu1 }
 0x242   : > { %v567_v42 = vpop.f32.mrb[1].mxu1  ;;  %v588_v44 = vmax.f32 %v565_v41, 0.0 }
 0x243   : > { %v589_v47 = vmax.f32 %v567_v42, 0.0 }
 0x245   : > { %v571_v43 = vpop.f32.mrb[2].mxu1 }
 0x246   : > { %v590_v45 = vmax.f32 %v571_v43, 0.0  ;;  %v573_v46 = vpop.f32.mrb[3].mxu1 }
 0x247   : > { %v591_v48 = vmax.f32 %v573_v46, 0.0 }
 0x248   : > { %v1514_v49 = vpack.c.bf16 %v590_v45, %v588_v44 }
 0x249   : > { %v1512_v50 = vpack.c.bf16 %v591_v48, %v589_v47  ;;  %v577_v51 = vpop.f32.mrb[4].mxu1 }
 0x24a   : > { %v579_v52 = vpop.f32.mrb[5].mxu1  ;;  %v592_v54 = vmax.f32 %v577_v51, 0.0 }
 0x24b   : > { %1513 = vmatprep.subr.bf16.mxu0 %v1512_v50  ;;  %v593_v57 = vmax.f32 %v579_v52, 0.0 }
 0x24c   : > { %1515 = vmatpush1.bf16.msra.mxu0 %v1514_v49 }
 0x24d   : > { %v583_v53 = vpop.f32.mrb[6].mxu1 }
 0x24e   : > { %v594_v55 = vmax.f32 %v583_v53, 0.0  ;;  %v585_v56 = vpop.f32.mrb[7].mxu1 }
 0x24f   : > { %v595_v58 = vmax.f32 %v585_v56, 0.0 }
 0x250   : > { %v1518_v59 = vpack.c.bf16 %v594_v55, %v592_v54 }
 0x251   : > { %v1516_v60 = vpack.c.bf16 %v595_v58, %v593_v57 }
 0x253   : > { %1517 = vmatprep.subr.bf16.mxu0 %v1516_v60 }
 0x254   : > { %1519 = vmatpush1.bf16.msra.mxu0 %v1518_v59 }
 0x257   : > { %1386 = vmatmul.mubr.msk.f32.vlgmr.msra.gmra.mrb[8].mxu0 %vm373_vm0, %v596_v61 }
 0x32a   : > { %v666_v62 = vpop.f32.mrb[8].mxu0 }
 0x32b   : > { %674 = vst [vmem:[#allocation2] sm:$0xff] %v666_v62  ;;  %v676_v63 = vmul.f32 0.1, %v666_v62  ;;  %v668_v0 = vpop.f32.mrb[9].mxu0 }
 0x32c   : > { %675 = vst [vmem:[#allocation2 + $0x8] sm:$0xff] %v668_v0  ;;  %v677_v1 = vmul.f32 0.1, %v668_v0 }
 0x32d   : > { %680 = vst [vmem:[#allocation4] sm:$0xff] %v676_v63 }
 0x32e   : > { %681 = vst [vmem:[#allocation4 + $0x8] sm:$0xff] %v677_v1 }
 0x32f PF: > { %p683_p7 = scmp.lt.s32.totalorder %s1932_s21, 0  ;;  %s684_s20 = ssub.s32 0, %s1932_s21 }
 0x330   : > { %s1387_s7 = smin.u32 %s1932_s21, %s684_s20  ;;  %p682_p11 = scmp.gt.s32.totalorder %s1932_s21, 0 }
 0x331   : > { %s686_s29 = sand.u32 1, %s1387_s7  }
 0x332   : > { %s687_s14 = ssub.s32 0, %s686_s29 }
 0x333   : > { %s2312_s14 = smov (!%p683_p7, %s687_s14), %s686_s29 }
 0x334   : > { %p1389_p10 = scmp.lt.s32.totalorder %s2312_s14, 0  ;;  %s693_s15 = sadd.s32 2, %s2312_s14 }
 0x336   : > { %s2314_s15 = smov (!%p1389_p10, %s693_s15), %s2312_s14 }
 0x337   : > { %p695_p12 = scmp.eq.s32.totalorder %s2314_s15, 1 }
 0x339   : > { %p696_p13 = pnand %p695_p12, %p682_p11 }
 0x33a   : > { %v704_v2 = vld [vmem:[#allocation11 + $0x8] sm:$0xff] (!%p696_p13)  ;;  %v706_v3 = vld [vmem:[#allocation11 + $0x18] sm:$0xff] (!%p696_p13)  ;;  %v703_v4 = vld [vmem:[#allocation11] sm:$0xff] (!%p696_p13) }
 0x33b   : > { %699 = sbr.rel (%p696_p13) target bundleno = 1111 (0x457), region = 68  ;;  %v1520_v5 = vpack.c.bf16 (!%p696_p13), %v706_v3, %v704_v2  ;;  %v705_v6 = vld [vmem:[#allocation11 + $0x10] sm:$0xff] (!%p696_p13)  ;;  %v708_v7 = vld [vmem:[#allocation11 + $0x28] sm:$0xff] (!%p696_p13)  ;;  %v710_v8 = vld [vmem:[#allocation11 + $0x38] sm:$0xff] (!%p696_p13) }
 0x33c   : > { %v1522_v9 = vpack.c.bf16 (!%p696_p13), %v705_v6, %v703_v4  ;;  %v1524_v10 = vpack.c.bf16 (!%p696_p13), %v710_v8, %v708_v7  ;;  %v707_v11 = vld [vmem:[#allocation11 + $0x20] sm:$0xff] (!%p696_p13)  ;;  %v709_v12 = vld [vmem:[#allocation11 + $0x30] sm:$0xff] (!%p696_p13)  ;;  %v712_v13 = vld [vmem:[#allocation11 + $0x48] sm:$0xff] (!%p696_p13) }
 0x33d   : > { %1521 = vmatprep.subr.bf16.mxu0 (!%p696_p13), %v1520_v5  ;;  %v714_v14 = vld [vmem:[#allocation11 + $0x58] sm:$0xff] (!%p696_p13)  ;;  %v1526_v15 = vpack.c.bf16 (!%p696_p13), %v709_v12, %v707_v11  ;;  %v711_v17 = vld [vmem:[#allocation11 + $0x40] sm:$0xff] (!%p696_p13)  ;;  %v713_v18 = vld [vmem:[#allocation11 + $0x50] sm:$0xff] (!%p696_p13) }
 0x33e   : > { %1523 = vmatpush1.bf16.msra.mxu0 (!%p696_p13), %v1522_v9  ;;  %v1528_v16 = vpack.c.bf16 (!%p696_p13), %v714_v14, %v712_v13  ;;  %v716_v19 = vld [vmem:[#allocation11 + $0x68] sm:$0xff] (!%p696_p13)  ;;  %v718_v20 = vld [vmem:[#allocation11 + $0x78] sm:$0xff] (!%p696_p13)  ;;  %v1530_v21 = vpack.c.bf16 (!%p696_p13), %v713_v18, %v711_v17  ;;  %v715_v23 = vld [vmem:[#allocation11 + $0x60] sm:$0xff] (!%p696_p13) }
 0x33f   : > { %1525 = vmatprep.subr.bf16.mxu0 (!%p696_p13), %v1524_v10  ;;  %v1532_v22 = vpack.c.bf16 (!%p696_p13), %v718_v20, %v716_v19  ;;  %v717_v24 = vld [vmem:[#allocation11 + $0x70] sm:$0xff] (!%p696_p13)  ;;  %v720_v25 = vld [vmem:[#allocation11 + $0x88] sm:$0xff] (!%p696_p13)  ;;  %v722_v26 = vld [vmem:[#allocation11 + $0x98] sm:$0xff] (!%p696_p13) }
 0x340   : > { %v1534_v27 = vpack.c.bf16 (!%p696_p13), %v717_v24, %v715_v23  ;;  %v1536_v28 = vpack.c.bf16 (!%p696_p13), %v722_v26, %v720_v25  ;;  %v719_v29 = vld [vmem:[#allocation11 + $0x80] sm:$0xff] (!%p696_p13)  ;;  %v721_v30 = vld [vmem:[#allocation11 + $0x90] sm:$0xff] (!%p696_p13)  ;;  %v724_v31 = vld [vmem:[#allocation11 + $0xa8] sm:$0xff] (!%p696_p13) }
 0x341   : > { %v726_v32 = vld [vmem:[#allocation11 + $0xb8] sm:$0xff] (!%p696_p13)  ;;  %v1538_v33 = vpack.c.bf16 (!%p696_p13), %v721_v30, %v719_v29  ;;  %v723_v35 = vld [vmem:[#allocation11 + $0xa0] sm:$0xff] (!%p696_p13)  ;;  %v725_v36 = vld [vmem:[#allocation11 + $0xb0] sm:$0xff] (!%p696_p13) }
 0x342   : > { %1527 = vmatpush1.bf16.msra.mxu0 %v1526_v15  ;;  %v1540_v34 = vpack.c.bf16 %v726_v32, %v724_v31  ;;  %v728_v37 = vld [vmem:[#allocation11 + $0xc8] sm:$0xff]  ;;  %v730_v38 = vld [vmem:[#allocation11 + $0xd8] sm:$0xff]  ;;  %v1542_v39 = vpack.c.bf16 %v725_v36, %v723_v35  ;;  %v727_v41 = vld [vmem:[#allocation11 + $0xc0] sm:$0xff] }
 0x343   : > { %1529 = vmatprep.subr.bf16.mxu0 %v1528_v16  ;;  %v1544_v40 = vpack.c.bf16 %v730_v38, %v728_v37  ;;  %v729_v42 = vld [vmem:[#allocation11 + $0xd0] sm:$0xff]  ;;  %v768_v43 = vld [vmem:[#allocation2 + $0x8] sm:$0xff]  ;;  %v732_v44 = vld [vmem:[#allocation11 + $0xe8] sm:$0xff] }
 0x344   : > { %v734_v45 = vld [vmem:[#allocation11 + $0xf8] sm:$0xff]  ;;  %833 = vmatprep.mubr.f32.mxu0 %v768_v43  ;;  %v1546_v46 = vpack.c.bf16 %v729_v42, %v727_v41  ;;  %v731_v48 = vld [vmem:[#allocation11 + $0xe0] sm:$0xff]  ;;  %v733_v49 = vld [vmem:[#allocation11 + $0xf0] sm:$0xff] }
 0x345   : > { %v1548_v47 = vpack.c.bf16 %v734_v45, %v732_v44  ;;  %v736_v50 = vld [vmem:[#allocation11 + $0x108] sm:$0xff]  ;;  %v738_v51 = vld [vmem:[#allocation11 + $0x118] sm:$0xff]  ;;  %v1550_v52 = vpack.c.bf16 %v733_v49, %v731_v48  ;;  %v735_v54 = vld [vmem:[#allocation11 + $0x100] sm:$0xff] }
 0x346   : > { %1531 = vmatpush1.bf16.msra.mxu0 %v1530_v21  ;;  %v1552_v53 = vpack.c.bf16 %v738_v51, %v736_v50  ;;  %v737_v55 = vld [vmem:[#allocation11 + $0x110] sm:$0xff]  ;;  %v740_v56 = vld [vmem:[#allocation11 + $0x128] sm:$0xff]  ;;  %v742_v57 = vld [vmem:[#allocation11 + $0x138] sm:$0xff] }
 0x347   : > { %1533 = vmatprep.subr.bf16.mxu0 %v1532_v22  ;;  %v1554_v58 = vpack.c.bf16 %v737_v55, %v735_v54  ;;  %v1556_v59 = vpack.c.bf16 %v742_v57, %v740_v56  ;;  %v739_v60 = vld [vmem:[#allocation11 + $0x120] sm:$0xff]  ;;  %v741_v61 = vld [vmem:[#allocation11 + $0x130] sm:$0xff]  ;;  %v744_v62 = vld [vmem:[#allocation11 + $0x148] sm:$0xff] }
 0x348   : > { %v746_v63 = vld [vmem:[#allocation11 + $0x158] sm:$0xff]  ;;  %v1558_v0 = vpack.c.bf16 %v741_v61, %v739_v60  ;;  %v743_v2 = vld [vmem:[#allocation11 + $0x140] sm:$0xff]  ;;  %v745_v3 = vld [vmem:[#allocation11 + $0x150] sm:$0xff] }
 0x349   : > { %v1560_v1 = vpack.c.bf16 %v746_v63, %v744_v62  ;;  %v748_v4 = vld [vmem:[#allocation11 + $0x168] sm:$0xff]  ;;  %v750_v5 = vld [vmem:[#allocation11 + $0x178] sm:$0xff]  ;;  %v1562_v6 = vpack.c.bf16 %v745_v3, %v743_v2  ;;  %v747_v8 = vld [vmem:[#allocation11 + $0x160] sm:$0xff] }
 0x34a   : > { %1535 = vmatpush1.bf16.msra.mxu0 %v1534_v27  ;;  %v1564_v7 = vpack.c.bf16 %v750_v5, %v748_v4  ;;  %v749_v9 = vld [vmem:[#allocation11 + $0x170] sm:$0xff]  ;;  %v752_v10 = vld [vmem:[#allocation11 + $0x188] sm:$0xff]  ;;  %v754_v11 = vld [vmem:[#allocation11 + $0x198] sm:$0xff] }
 0x34b   : > { %1537 = vmatprep.subr.bf16.mxu0 %v1536_v28  ;;  %v1566_v12 = vpack.c.bf16 %v749_v9, %v747_v8  ;;  %v1568_v13 = vpack.c.bf16 %v754_v11, %v752_v10  ;;  %v751_v14 = vld [vmem:[#allocation11 + $0x180] sm:$0xff]  ;;  %v753_v15 = vld [vmem:[#allocation11 + $0x190] sm:$0xff]  ;;  %v756_v16 = vld [vmem:[#allocation11 + $0x1a8] sm:$0xff] }
 0x34c   : > { %v758_v17 = vld [vmem:[#allocation11 + $0x1b8] sm:$0xff]  ;;  %v1570_v18 = vpack.c.bf16 %v753_v15, %v751_v14  ;;  %v755_v20 = vld [vmem:[#allocation11 + $0x1a0] sm:$0xff]  ;;  %v757_v21 = vld [vmem:[#allocation11 + $0x1b0] sm:$0xff] }
 0x34d   : > { %v1572_v19 = vpack.c.bf16 %v758_v17, %v756_v16  ;;  %v760_v22 = vld [vmem:[#allocation11 + $0x1c8] sm:$0xff]  ;;  %v762_v23 = vld [vmem:[#allocation11 + $0x1d8] sm:$0xff]  ;;  %v1574_v24 = vpack.c.bf16 %v757_v21, %v755_v20  ;;  %v759_v26 = vld [vmem:[#allocation11 + $0x1c0] sm:$0xff] }
 0x34e   : > { %1539 = vmatpush1.bf16.msra.mxu0 %v1538_v33  ;;  %v1576_v25 = vpack.c.bf16 %v762_v23, %v760_v22  ;;  %v761_v27 = vld [vmem:[#allocation11 + $0x1d0] sm:$0xff]  ;;  %v764_v28 = vld [vmem:[#allocation11 + $0x1e8] sm:$0xff]  ;;  %v766_v29 = vld [vmem:[#allocation11 + $0x1f8] sm:$0xff] }
 0x34f   : > { %1541 = vmatprep.subr.bf16.mxu0 %v1540_v34  ;;  %v1578_v30 = vpack.c.bf16 %v761_v27, %v759_v26  ;;  %v1580_v31 = vpack.c.bf16 %v766_v29, %v764_v28  ;;  %v763_v32 = vld [vmem:[#allocation11 + $0x1e0] sm:$0xff]  ;;  %v765_v33 = vld [vmem:[#allocation11 + $0x1f0] sm:$0xff] }
 0x350   : > { %v1582_v34 = vpack.c.bf16 %v765_v33, %v763_v32  ;;  %v767_v35 = vld [vmem:[#allocation2] sm:$0xff] }
 0x351   : > { %v845_v37 = vld [vmem:[#allocation4] sm:$0xff] }
 0x352   : > { %1543 = vmatpush1.bf16.msra.mxu0 %v1542_v39 }
 0x353   : > { %1545 = vmatprep.subr.bf16.mxu0 %v1544_v40  ;;  %v846_v40 = vld [vmem:[#allocation4 + $0x8] sm:$0xff] }
 0x356   : > { %1547 = vmatpush1.bf16.msra.mxu0 %v1546_v46 }
 0x357   : > { %1549 = vmatprep.subr.bf16.mxu0 %v1548_v47 }
 0x35a   : > { %1551 = vmatpush1.bf16.msra.mxu0 %v1550_v52 }
 0x35b   : > { %1553 = vmatprep.subr.bf16.mxu0 %v1552_v53 }
 0x35e   : > { %1555 = vmatpush1.bf16.msra.mxu0 %v1554_v58 }
 0x35f   : > { %1557 = vmatprep.subr.bf16.mxu0 %v1556_v59 }
 0x362   : > { %1559 = vmatpush1.bf16.msra.mxu0 %v1558_v0 }
 0x363   : > { %1561 = vmatprep.subr.bf16.mxu0 %v1560_v1 }
 0x366   : > { %1563 = vmatpush1.bf16.msra.mxu0 %v1562_v6 }
 0x367   : > { %1565 = vmatprep.subr.bf16.mxu0 %v1564_v7 }
 0x36a   : > { %1567 = vmatpush1.bf16.msra.mxu0 %v1566_v12 }
 0x36b   : > { %1569 = vmatprep.subr.bf16.mxu0 %v1568_v13 }
 0x36e   : > { %1571 = vmatpush1.bf16.msra.mxu0 %v1570_v18 }
 0x36f   : > { %1573 = vmatprep.subr.bf16.mxu0 %v1572_v19 }
 0x372   : > { %1575 = vmatpush1.bf16.msra.mxu0 %v1574_v24 }
 0x373   : > { %1577 = vmatprep.subr.bf16.mxu0 %v1576_v25 }
 0x376   : > { %1579 = vmatpush1.bf16.msra.mxu0 %v1578_v30 }
 0x377   : > { %1581 = vmatprep.subr.bf16.mxu0 %v1580_v31 }
 0x37a   : > { %1583 = vmatpush1.bf16.msra.mxu0 %v1582_v34 }
 0x37d   : > { %834 = vmatmul.mubr.f32.vlgmr.msra.gmra.mrb[0].mxu0 %v767_v35 }
 0x450   : > { %v835_v36 = vpop.f32.mrb[0].mxu0 }
 0x451   : > { %v840_v38 = vmul.f32 0.9, %v835_v36  ;;  %v837_v39 = vpop.f32.mrb[1].mxu0 }
 0x452   : > { %v841_v41 = vmul.f32 0.9, %v837_v39 }
 0x453   : > { %v847_v42 = vadd.f32 %v845_v37, %v840_v38 }
 0x454   : > { %v848_v43 = vadd.f32 %v846_v40, %v841_v41 }
 0x455   : > { %851 = vst [vmem:[#allocation3] sm:$0xff] %v847_v42 }
 0x456   : > { %852 = vst [vmem:[#allocation3 + $0x8] sm:$0xff] %v848_v43 }
 0x457 PF: > { %p853_p0 = scmp.eq.s32.totalorder %s2314_s15, 0 }
 0x459   : > { %p854_p1 = pnand %p853_p0, %p682_p11 }
 0x45a   : > { %v862_v44 = vld [vmem:[#allocation11 + $0x8] sm:$0xff] (!%p854_p1)  ;;  %v864_v45 = vld [vmem:[#allocation11 + $0x18] sm:$0xff] (!%p854_p1)  ;;  %v861_v46 = vld [vmem:[#allocation11] sm:$0xff] (!%p854_p1) }
 0x45b   : > { %857 = sbr.rel (%p854_p1) target bundleno = 1399 (0x577), region = 72  ;;  %v1584_v47 = vpack.c.bf16 (!%p854_p1), %v864_v45, %v862_v44  ;;  %v863_v48 = vld [vmem:[#allocation11 + $0x10] sm:$0xff] (!%p854_p1)  ;;  %v866_v49 = vld [vmem:[#allocation11 + $0x28] sm:$0xff] (!%p854_p1)  ;;  %v868_v50 = vld [vmem:[#allocation11 + $0x38] sm:$0xff] (!%p854_p1) }
 0x45c   : > { %v1586_v51 = vpack.c.bf16 (!%p854_p1), %v863_v48, %v861_v46  ;;  %v1588_v52 = vpack.c.bf16 (!%p854_p1), %v868_v50, %v866_v49  ;;  %v865_v53 = vld [vmem:[#allocation11 + $0x20] sm:$0xff] (!%p854_p1)  ;;  %v867_v54 = vld [vmem:[#allocation11 + $0x30] sm:$0xff] (!%p854_p1)  ;;  %v870_v55 = vld [vmem:[#allocation11 + $0x48] sm:$0xff] (!%p854_p1) }
 0x45d   : > { %1585 = vmatprep.subr.bf16.mxu0 (!%p854_p1), %v1584_v47  ;;  %v872_v56 = vld [vmem:[#allocation11 + $0x58] sm:$0xff] (!%p854_p1)  ;;  %v1590_v57 = vpack.c.bf16 (!%p854_p1), %v867_v54, %v865_v53  ;;  %v869_v59 = vld [vmem:[#allocation11 + $0x40] sm:$0xff] (!%p854_p1)  ;;  %v871_v60 = vld [vmem:[#allocation11 + $0x50] sm:$0xff] (!%p854_p1) }
 0x45e   : > { %1587 = vmatpush1.bf16.msra.mxu0 (!%p854_p1), %v1586_v51  ;;  %v1592_v58 = vpack.c.bf16 (!%p854_p1), %v872_v56, %v870_v55  ;;  %v874_v61 = vld [vmem:[#allocation11 + $0x68] sm:$0xff] (!%p854_p1)  ;;  %v876_v62 = vld [vmem:[#allocation11 + $0x78] sm:$0xff] (!%p854_p1)  ;;  %v1594_v63 = vpack.c.bf16 (!%p854_p1), %v871_v60, %v869_v59  ;;  %v873_v1 = vld [vmem:[#allocation11 + $0x60] sm:$0xff] (!%p854_p1) }
 0x45f   : > { %1589 = vmatprep.subr.bf16.mxu0 (!%p854_p1), %v1588_v52  ;;  %v1596_v0 = vpack.c.bf16 (!%p854_p1), %v876_v62, %v874_v61  ;;  %v875_v2 = vld [vmem:[#allocation11 + $0x70] sm:$0xff] (!%p854_p1)  ;;  %v878_v3 = vld [vmem:[#allocation11 + $0x88] sm:$0xff] (!%p854_p1)  ;;  %v880_v4 = vld [vmem:[#allocation11 + $0x98] sm:$0xff] (!%p854_p1) }
 0x460   : > { %v1598_v5 = vpack.c.bf16 (!%p854_p1), %v875_v2, %v873_v1  ;;  %v1600_v6 = vpack.c.bf16 (!%p854_p1), %v880_v4, %v878_v3  ;;  %v877_v7 = vld [vmem:[#allocation11 + $0x80] sm:$0xff] (!%p854_p1)  ;;  %v879_v8 = vld [vmem:[#allocation11 + $0x90] sm:$0xff] (!%p854_p1)  ;;  %v882_v9 = vld [vmem:[#allocation11 + $0xa8] sm:$0xff] (!%p854_p1) }
 0x461   : > { %v884_v10 = vld [vmem:[#allocation11 + $0xb8] sm:$0xff] (!%p854_p1)  ;;  %v1602_v11 = vpack.c.bf16 (!%p854_p1), %v879_v8, %v877_v7  ;;  %v881_v13 = vld [vmem:[#allocation11 + $0xa0] sm:$0xff] (!%p854_p1)  ;;  %v883_v14 = vld [vmem:[#allocation11 + $0xb0] sm:$0xff] (!%p854_p1) }
 0x462   : > { %1591 = vmatpush1.bf16.msra.mxu0 %v1590_v57  ;;  %v1604_v12 = vpack.c.bf16 %v884_v10, %v882_v9  ;;  %v886_v15 = vld [vmem:[#allocation11 + $0xc8] sm:$0xff]  ;;  %v888_v16 = vld [vmem:[#allocation11 + $0xd8] sm:$0xff]  ;;  %v1606_v17 = vpack.c.bf16 %v883_v14, %v881_v13  ;;  %v885_v19 = vld [vmem:[#allocation11 + $0xc0] sm:$0xff] }
 0x463   : > { %1593 = vmatprep.subr.bf16.mxu0 %v1592_v58  ;;  %v1608_v18 = vpack.c.bf16 %v888_v16, %v886_v15  ;;  %v887_v20 = vld [vmem:[#allocation11 + $0xd0] sm:$0xff]  ;;  %v926_v21 = vld [vmem:[#allocation3 + $0x8] sm:$0xff]  ;;  %v892_v23 = vld [vmem:[#allocation11 + $0xf8] sm:$0xff] }
 0x464   : > { %v890_v22 = vld [vmem:[#allocation11 + $0xe8] sm:$0xff]  ;;  %991 = vmatprep.mubr.f32.mxu0 %v926_v21  ;;  %v1610_v24 = vpack.c.bf16 %v887_v20, %v885_v19  ;;  %v889_v26 = vld [vmem:[#allocation11 + $0xe0] sm:$0xff]  ;;  %v891_v27 = vld [vmem:[#allocation11 + $0xf0] sm:$0xff] }
 0x465   : > { %v1612_v25 = vpack.c.bf16 %v892_v23, %v890_v22  ;;  %v894_v28 = vld [vmem:[#allocation11 + $0x108] sm:$0xff]  ;;  %v896_v29 = vld [vmem:[#allocation11 + $0x118] sm:$0xff]  ;;  %v1614_v30 = vpack.c.bf16 %v891_v27, %v889_v26  ;;  %v893_v32 = vld [vmem:[#allocation11 + $0x100] sm:$0xff] }
 0x466   : > { %1595 = vmatpush1.bf16.msra.mxu0 %v1594_v63  ;;  %v1616_v31 = vpack.c.bf16 %v896_v29, %v894_v28  ;;  %v895_v33 = vld [vmem:[#allocation11 + $0x110] sm:$0xff]  ;;  %v898_v34 = vld [vmem:[#allocation11 + $0x128] sm:$0xff]  ;;  %v900_v35 = vld [vmem:[#allocation11 + $0x138] sm:$0xff] }
 0x467   : > { %1597 = vmatprep.subr.bf16.mxu0 %v1596_v0  ;;  %v1618_v36 = vpack.c.bf16 %v895_v33, %v893_v32  ;;  %v1620_v37 = vpack.c.bf16 %v900_v35, %v898_v34  ;;  %v897_v38 = vld [vmem:[#allocation11 + $0x120] sm:$0xff]  ;;  %v899_v39 = vld [vmem:[#allocation11 + $0x130] sm:$0xff]  ;;  %v902_v40 = vld [vmem:[#allocation11 + $0x148] sm:$0xff] }
 0x468   : > { %v904_v41 = vld [vmem:[#allocation11 + $0x158] sm:$0xff]  ;;  %v1622_v42 = vpack.c.bf16 %v899_v39, %v897_v38  ;;  %v901_v44 = vld [vmem:[#allocation11 + $0x140] sm:$0xff]  ;;  %v903_v45 = vld [vmem:[#allocation11 + $0x150] sm:$0xff] }
 0x469   : > { %v1624_v43 = vpack.c.bf16 %v904_v41, %v902_v40  ;;  %v906_v46 = vld [vmem:[#allocation11 + $0x168] sm:$0xff]  ;;  %v908_v47 = vld [vmem:[#allocation11 + $0x178] sm:$0xff]  ;;  %v1626_v48 = vpack.c.bf16 %v903_v45, %v901_v44  ;;  %v905_v50 = vld [vmem:[#allocation11 + $0x160] sm:$0xff] }
 0x46a   : > { %1599 = vmatpush1.bf16.msra.mxu0 %v1598_v5  ;;  %v1628_v49 = vpack.c.bf16 %v908_v47, %v906_v46  ;;  %v907_v51 = vld [vmem:[#allocation11 + $0x170] sm:$0xff]  ;;  %v910_v52 = vld [vmem:[#allocation11 + $0x188] sm:$0xff]  ;;  %v912_v53 = vld [vmem:[#allocation11 + $0x198] sm:$0xff] }
 0x46b   : > { %1601 = vmatprep.subr.bf16.mxu0 %v1600_v6  ;;  %v1630_v54 = vpack.c.bf16 %v907_v51, %v905_v50  ;;  %v1632_v55 = vpack.c.bf16 %v912_v53, %v910_v52  ;;  %v909_v56 = vld [vmem:[#allocation11 + $0x180] sm:$0xff]  ;;  %v911_v57 = vld [vmem:[#allocation11 + $0x190] sm:$0xff]  ;;  %v914_v58 = vld [vmem:[#allocation11 + $0x1a8] sm:$0xff] }
 0x46c   : > { %v916_v59 = vld [vmem:[#allocation11 + $0x1b8] sm:$0xff]  ;;  %v1634_v60 = vpack.c.bf16 %v911_v57, %v909_v56  ;;  %v913_v62 = vld [vmem:[#allocation11 + $0x1a0] sm:$0xff]  ;;  %v915_v63 = vld [vmem:[#allocation11 + $0x1b0] sm:$0xff] }
 0x46d   : > { %v1636_v61 = vpack.c.bf16 %v916_v59, %v914_v58  ;;  %v918_v0 = vld [vmem:[#allocation11 + $0x1c8] sm:$0xff]  ;;  %v920_v1 = vld [vmem:[#allocation11 + $0x1d8] sm:$0xff]  ;;  %v1638_v2 = vpack.c.bf16 %v915_v63, %v913_v62  ;;  %v917_v4 = vld [vmem:[#allocation11 + $0x1c0] sm:$0xff] }
 0x46e   : > { %1603 = vmatpush1.bf16.msra.mxu0 %v1602_v11  ;;  %v1640_v3 = vpack.c.bf16 %v920_v1, %v918_v0  ;;  %v919_v5 = vld [vmem:[#allocation11 + $0x1d0] sm:$0xff]  ;;  %v922_v6 = vld [vmem:[#allocation11 + $0x1e8] sm:$0xff]  ;;  %v924_v7 = vld [vmem:[#allocation11 + $0x1f8] sm:$0xff] }
 0x46f   : > { %1605 = vmatprep.subr.bf16.mxu0 %v1604_v12  ;;  %v1642_v8 = vpack.c.bf16 %v919_v5, %v917_v4  ;;  %v1644_v9 = vpack.c.bf16 %v924_v7, %v922_v6  ;;  %v921_v10 = vld [vmem:[#allocation11 + $0x1e0] sm:$0xff]  ;;  %v923_v11 = vld [vmem:[#allocation11 + $0x1f0] sm:$0xff] }
 0x470   : > { %v1646_v12 = vpack.c.bf16 %v923_v11, %v921_v10  ;;  %v925_v13 = vld [vmem:[#allocation3] sm:$0xff]  ;;  %v1003_v15 = vld [vmem:[#allocation4] sm:$0xff] }
 0x472   : > { %1607 = vmatpush1.bf16.msra.mxu0 %v1606_v17 }
 0x473   : > { %1609 = vmatprep.subr.bf16.mxu0 %v1608_v18  ;;  %v1004_v18 = vld [vmem:[#allocation4 + $0x8] sm:$0xff] }
 0x476   : > { %1611 = vmatpush1.bf16.msra.mxu0 %v1610_v24 }
 0x477   : > { %1613 = vmatprep.subr.bf16.mxu0 %v1612_v25 }
 0x47a   : > { %1615 = vmatpush1.bf16.msra.mxu0 %v1614_v30 }
 0x47b   : > { %1617 = vmatprep.subr.bf16.mxu0 %v1616_v31 }
 0x47e   : > { %1619 = vmatpush1.bf16.msra.mxu0 %v1618_v36 }
 0x47f   : > { %1621 = vmatprep.subr.bf16.mxu0 %v1620_v37 }
 0x482   : > { %1623 = vmatpush1.bf16.msra.mxu0 %v1622_v42 }
 0x483   : > { %1625 = vmatprep.subr.bf16.mxu0 %v1624_v43 }
 0x486   : > { %1627 = vmatpush1.bf16.msra.mxu0 %v1626_v48 }
 0x487   : > { %1629 = vmatprep.subr.bf16.mxu0 %v1628_v49 }
 0x48a   : > { %1631 = vmatpush1.bf16.msra.mxu0 %v1630_v54 }
 0x48b   : > { %1633 = vmatprep.subr.bf16.mxu0 %v1632_v55 }
 0x48e   : > { %1635 = vmatpush1.bf16.msra.mxu0 %v1634_v60 }
 0x48f   : > { %1637 = vmatprep.subr.bf16.mxu0 %v1636_v61 }
 0x492   : > { %1639 = vmatpush1.bf16.msra.mxu0 %v1638_v2 }
 0x493   : > { %1641 = vmatprep.subr.bf16.mxu0 %v1640_v3 }
 0x496   : > { %1643 = vmatpush1.bf16.msra.mxu0 %v1642_v8 }
 0x497   : > { %1645 = vmatprep.subr.bf16.mxu0 %v1644_v9 }
 0x49a   : > { %1647 = vmatpush1.bf16.msra.mxu0 %v1646_v12 }
 0x49d   : > { %992 = vmatmul.mubr.f32.vlgmr.msra.gmra.mrb[0].mxu0 %v925_v13 }
 0x570   : > { %v993_v14 = vpop.f32.mrb[0].mxu0 }
 0x571   : > { %v998_v16 = vmul.f32 0.9, %v993_v14  ;;  %v995_v17 = vpop.f32.mrb[1].mxu0 }
 0x572   : > { %v999_v19 = vmul.f32 0.9, %v995_v17 }
 0x573   : > { %v1005_v20 = vadd.f32 %v1003_v15, %v998_v16 }
 0x574   : > { %v1006_v21 = vadd.f32 %v1004_v18, %v999_v19 }
 0x575   : > { %1009 = vst [vmem:[#allocation2] sm:$0xff] %v1005_v20 }
 0x576   : > { %1010 = vst [vmem:[#allocation2 + $0x8] sm:$0xff] %v1006_v21 }
 0x577 PF: > { %p1011_p2 = scmp.eq.s32.totalorder %s1932_s21, 3 }
 0x578   : > { %v1018_v22 = vlaneseq (%p1011_p2)  ;;  %v1152_v23 = vld [vmem:[#allocation3 + $0x8] sm:$0xff] (%p1011_p2)  ;;  %v2162_v24 = vld [vmem:[%s2294_s5] ss:$0 sm:$0xff] (%p1011_p2)  ;;  %v1951_v34 = vmov (%p1011_p2), 1.0|1.0   ;;  %v1151_v58 = vld [vmem:[#allocation3] sm:$0xff] (%p1011_p2) }
 0x579   : > { %1016 = sbr.rel (!%p1011_p2) target bundleno = 1712 (0x6b0), region = 76  ;;  %1217 = vmatprep.mubr.f32.mxu0 (%p1011_p2), %v1152_v23 }
 0x57a   : > { %v2164_v25 = vshrl.u32 (%p1011_p2), %v1018_v22, 7 }
 0x57c   : > { %v1035_v26 = vadd.s32 (%p1011_p2), 128, %v2164_v25  ;;  %v1036_v27 = vadd.s32 (%p1011_p2), 136, %v2164_v25  ;;  %v1020_v28 = vadd.s32 (%p1011_p2), 8, %v2164_v25  ;;  %vm1055_vm1 = vcmp.eq.s32.totalorder (%p1011_p2), %v2164_v25, %v2162_v24 }
 0x57d   : > { %v1037_v29 = vadd.s32 (%p1011_p2), 144, %v2164_v25  ;;  %v1038_v30 = vadd.s32 (%p1011_p2), 152, %v2164_v25  ;;  %v1021_v31 = vadd.s32 (%p1011_p2), 16, %v2164_v25  ;;  %v1022_v32 = vadd.s32 (%p1011_p2), 24, %v2164_v25 }
 0x57e   : > { %vm1071_vm2 = vcmp.eq.s32.totalorder (%p1011_p2), %v1035_v26, %v2162_v24  ;;  %vm1072_vm3 = vcmp.eq.s32.totalorder (%p1011_p2), %v1036_v27, %v2162_v24  ;;  %vm1056_vm4 = vcmp.eq.s32.totalorder (%p1011_p2), %v1020_v28, %v2162_v24  ;;  %v1039_v33 = vadd.s32 (%p1011_p2), 160, %v2164_v25 }
 0x57f   : > { %vm1648_vm5 = vmpackc.low (%p1011_p2), %vm1072_vm3, %vm1071_vm2  ;;  %vm1073_vm6 = vcmp.eq.s32.totalorder (%p1011_p2), %v1037_v29, %v2162_v24  ;;  %vm1074_vm7 = vcmp.eq.s32.totalorder (%p1011_p2), %v1038_v30, %v2162_v24  ;;  %vm1057_vm8 = vcmp.eq.s32.totalorder (%p1011_p2), %v1021_v31, %v2162_v24  ;;  %vm1058_vm9 = vcmp.eq.s32.totalorder (%p1011_p2), %v1022_v32, %v2162_v24 }
 0x580   : > { %1649 = vmatprep.subr.msk.bf16.mxu0 %vm1648_vm5, %v1951_v34  ;;  %vm1650_vm10 = vmpackc.low %vm1056_vm4, %vm1055_vm1  ;;  %v1040_v35 = vadd.s32 168, %v2164_v25  ;;  %vm1075_vm11 = vcmp.eq.s32.totalorder %v1039_v33, %v2162_v24  ;;  %v1023_v36 = vadd.s32 32, %v2164_v25  ;;  %v1024_v37 = vadd.s32 40, %v2164_v25 }
 0x581   : > { %1651 = vmatpush3.bf16.msk.msra.mxu0 %vm1650_vm10, %v1951_v34  ;;  %vm1652_vm12 = vmpackc.low %vm1074_vm7, %vm1073_vm6  ;;  %v1041_v38 = vadd.s32 176, %v2164_v25  ;;  %v1042_v39 = vadd.s32 184, %v2164_v25  ;;  %v1025_v40 = vadd.s32 48, %v2164_v25  ;;  %v1026_v41 = vadd.s32 56, %v2164_v25 }
 0x582   : > { %1653 = vmatprep.subr.msk.bf16.mxu0 %vm1652_vm12, %v1951_v34  ;;  %vm1654_vm13 = vmpackc.low %vm1058_vm9, %vm1057_vm8  ;;  %vm1076_vm14 = vcmp.eq.s32.totalorder %v1040_v35, %v2162_v24  ;;  %vm1059_vm0 = vcmp.eq.s32.totalorder %v1023_v36, %v2162_v24  ;;  %vm1060_vm1 = vcmp.eq.s32.totalorder %v1024_v37, %v2162_v24  ;;  %v1043_v42 = vadd.s32 192, %v2164_v25 }
 0x583   : > { %vm1656_vm15 = vmpackc.low %vm1076_vm14, %vm1075_vm11  ;;  %vm1077_vm2 = vcmp.eq.s32.totalorder %v1041_v38, %v2162_v24  ;;  %vm1078_vm3 = vcmp.eq.s32.totalorder %v1042_v39, %v2162_v24  ;;  %v1044_v43 = vadd.s32 200, %v2164_v25  ;;  %vm1061_vm6 = vcmp.eq.s32.totalorder %v1025_v40, %v2162_v24 }
 0x584   : > { %vm1658_vm4 = vmpackc.low %vm1060_vm1, %vm1059_vm0  ;;  %vm1062_vm7 = vcmp.eq.s32.totalorder %v1026_v41, %v2162_v24  ;;  %v1027_v44 = vadd.s32 64, %v2164_v25  ;;  %v1028_v45 = vadd.s32 72, %v2164_v25  ;;  %vm1079_vm8 = vcmp.eq.s32.totalorder %v1043_v42, %v2162_v24 }
 0x585   : > { %1655 = vmatpush3.bf16.msk.msra.mxu0 %vm1654_vm13, %v1951_v34  ;;  %vm1660_vm5 = vmpackc.low %vm1078_vm3, %vm1077_vm2  ;;  %vm1080_vm9 = vcmp.eq.s32.totalorder %v1044_v43, %v2162_v24  ;;  %v1045_v46 = vadd.s32 208, %v2164_v25  ;;  %v1046_v47 = vadd.s32 216, %v2164_v25  ;;  %v1029_v48 = vadd.s32 80, %v2164_v25 }
 0x586   : > { %1657 = vmatprep.subr.msk.bf16.mxu0 %vm1656_vm15, %v1951_v34  ;;  %vm1662_vm10 = vmpackc.low %vm1062_vm7, %vm1061_vm6  ;;  %vm1063_vm12 = vcmp.eq.s32.totalorder %v1027_v44, %v2162_v24  ;;  %vm1064_vm13 = vcmp.eq.s32.totalorder %v1028_v45, %v2162_v24  ;;  %v1030_v49 = vadd.s32 88, %v2164_v25  ;;  %v1047_v50 = vadd.s32 224, %v2164_v25 }
 0x587   : > { %vm1664_vm11 = vmpackc.low %vm1080_vm9, %vm1079_vm8  ;;  %vm1081_vm14 = vcmp.eq.s32.totalorder %v1045_v46, %v2162_v24  ;;  %vm1082_vm15 = vcmp.eq.s32.totalorder %v1046_v47, %v2162_v24  ;;  %v1048_v51 = vadd.s32 232, %v2164_v25  ;;  %vm1065_vm2 = vcmp.eq.s32.totalorder %v1029_v48, %v2162_v24 }
 0x588   : > { %vm1666_vm0 = vmpackc.low %vm1064_vm13, %vm1063_vm12  ;;  %vm1066_vm3 = vcmp.eq.s32.totalorder %v1030_v49, %v2162_v24  ;;  %v1031_v52 = vadd.s32 96, %v2164_v25  ;;  %v1032_v53 = vadd.s32 104, %v2164_v25  ;;  %v1049_v54 = vadd.s32 240, %v2164_v25 }
 0x589   : > { %1659 = vmatpush3.bf16.msk.msra.mxu0 %vm1658_vm4, %v1951_v34  ;;  %vm1668_vm1 = vmpackc.low %vm1082_vm15, %vm1081_vm14  ;;  %vm1083_vm4 = vcmp.eq.s32.totalorder %v1047_v50, %v2162_v24  ;;  %v1050_v55 = vadd.s32 248, %v2164_v25  ;;  %v1033_v56 = vadd.s32 112, %v2164_v25  ;;  %v1034_v57 = vadd.s32 120, %v2164_v25 }
 0x58a   : > { %1661 = vmatprep.subr.msk.bf16.mxu0 %vm1660_vm5, %v1951_v34  ;;  %vm1084_vm5 = vcmp.eq.s32.totalorder %v1048_v51, %v2162_v24  ;;  %vm1670_vm6 = vmpackc.low %vm1066_vm3, %vm1065_vm2  ;;  %vm1067_vm8 = vcmp.eq.s32.totalorder %v1031_v52, %v2162_v24  ;;  %vm1068_vm9 = vcmp.eq.s32.totalorder %v1032_v53, %v2162_v24 }
 0x58b   : > { %vm1672_vm7 = vmpackc.low %vm1084_vm5, %vm1083_vm4  ;;  %vm1069_vm14 = vcmp.eq.s32.totalorder %v1033_v56, %v2162_v24  ;;  %vm1070_vm15 = vcmp.eq.s32.totalorder %v1034_v57, %v2162_v24 }
 0x58c   : > { %vm1674_vm12 = vmpackc.low %vm1068_vm9, %vm1067_vm8 }
 0x58d   : > { %1663 = vmatpush3.bf16.msk.msra.mxu0 %vm1662_vm10, %v1951_v34  ;;  %vm1085_vm10 = vcmp.eq.s32.totalorder %v1049_v54, %v2162_v24 }
 0x58e   : > { %1665 = vmatprep.subr.msk.bf16.mxu0 %vm1664_vm11, %v1951_v34  ;;  %vm1086_vm11 = vcmp.eq.s32.totalorder %v1050_v55, %v2162_v24 }
 0x58f   : > { %vm1676_vm13 = vmpackc.low %vm1086_vm11, %vm1085_vm10 }
 0x591   : > { %1667 = vmatpush3.bf16.msk.msra.mxu0 %vm1666_vm0, %v1951_v34  ;;  %vm1678_vm0 = vmpackc.low %vm1070_vm15, %vm1069_vm14 }
 0x592   : > { %1669 = vmatprep.subr.msk.bf16.mxu0 %vm1668_vm1, %v1951_v34  ;;  %vm1223_vm1 = vcmask 64512  }
 0x595   : > { %1671 = vmatpush3.bf16.msk.msra.mxu0 %vm1670_vm6, %v1951_v34 }
 0x596   : > { %1673 = vmatprep.subr.msk.bf16.mxu0 %vm1672_vm7, %v1951_v34 }
 0x599   : > { %1675 = vmatpush3.bf16.msk.msra.mxu0 %vm1674_vm12, %v1951_v34 }
 0x59a   : > { %1677 = vmatprep.subr.msk.bf16.mxu0 %vm1676_vm13, %v1951_v34 }
 0x59d   : > { %1679 = vmatpush3.bf16.msk.msra.mxu0 %vm1678_vm0, %v1951_v34 }
 0x5a0   : > { %1218 = vmatmul.mubr.f32.vlgmr.msra.gmra.mrb[0].mxu0 %v1151_v58 }
 0x673   : > { %v1493_v59 = vpop.f32.mrb[0].mxu0 }
 0x674   : > { %v1494_v60 = vpop.f32.mrb[1].mxu0 }
 0x675   : > { %v1495_v61 = vadd.f32 %v1494_v60, %v1493_v59 }
 0x677   : > { %v1224_v62 = vsel %vm1223_vm1, %v1495_v61, -inf }
 0x678   : > { %v1225_v63 = vrot.slane %v1224_v62, 4 }
 0x67a   : > { %v1226_v0 = vmax.f32 %v1224_v62, %v1225_v63 }
 0x67c   : > { %v1227_v1 = vrot.slane %v1226_v0, 2 }
 0x67e   : > { %v1228_v2 = vmax.f32 %v1226_v0, %v1227_v1 }
 0x680   : > { %v1229_v3 = vrot.slane %v1228_v2, 1 }
 0x682   : > { %v1230_v4 = vmax.f32 %v1228_v2, %v1229_v3 }
 0x684   : > { %v1231_v5 = vsub.f32 %v1495_v61, %v1230_v4 }
 0x686   : > { %v1232_v6 = vmul.f32 1.442695, %v1231_v5 }
 0x688   : > { %1760 = vpow2.f32 %v1232_v6 }
 0x692   : > { %v1761_v7 = vpop.eup %1760 }
 0x693   : > { %v1234_v8 = vsel %vm1223_vm1, %v1761_v7, 0.0 }
 0x694   : > { %v1235_v9 = vrot.slane %v1234_v8, 4 }
 0x696   : > { %v1236_v10 = vadd.f32 %v1235_v9, %v1234_v8 }
 0x698   : > { %v1237_v11 = vrot.slane %v1236_v10, 2 }
 0x69a   : > { %v1238_v12 = vadd.f32 %v1237_v11, %v1236_v10 }
 0x69c   : > { %v1239_v13 = vrot.slane %v1238_v12, 1 }
 0x69e   : > { %v1240_v14 = vadd.f32 %v1239_v13, %v1238_v12 }
 0x6a0   : > { %1762 = vlog2.f32 %v1240_v14 }
 0x6aa   : > { %v1763_v15 = vpop.eup %1762 }
 0x6ab   : > { %v1242_v16 = vmul.f32 0.6931472, %v1763_v15 }
 0x6ad   : > { %v1243_v17 = vsub.f32 %v1231_v5, %v1242_v16 }
 0x6af   : > { %1244 = vst.msk [vmem:[#allocation13] sm:$0xff] %vm1223_vm1, %v1243_v17 }
 0x6b0 PF: > { %p2254_p5 = scmp.eq.s32.totalorder %s1365_s24, 3  ;;  %s1952_s30 = smov [#allocation13]  }
 0x6b1   : > { %s1252_s9 = sshll.u32 %s1952_s30, 4  ;;  %s1253_s9 = int_to_ptr.vmem [resolvable:$true] %s1252_s9 }
 0x6b2   : > { %s1876_s10 = scalar_lea.vmem %s1253_s9, 128  ;;  %p1883_p9 = scmp.lt.s32.totalorder %s1253_s9, %s1253_s9 }
 0x6b3   : > { %p1877_p3 = scmp.ne.s32.totalorder %s1253_s9, %s1876_s10  ;;  %p1884_p8 = scmp.lt.s32.totalorder %s1876_s10, %s1876_s10 }
 0x6b5   : > { %p1878_p4 = pnand %p1877_p3, %p2254_p5  ;;  %p1885_p7 = por %p1884_p8, %p1883_p9 }
 0x6b7   : > { %p1879_p6 = pneg %p1878_p4 }
 0x6b9   : > { %p1886_p10 = pnand %p1885_p7, %p1879_p6 }
 0x6bb   : > { %1889 = shalt.err (!%p1886_p10)
}
 0x6bc   : > { %s1890_s24 = scalar_lea.hbm %s2295_s6, 128 }
 0x6bd   : > { %p1891_p11 = scmp.ne.s32.totalorder %s2295_s6, %s1890_s24  ;;  %p1896_p0 = scmp.lt.u32.totalorder %s1890_s24, %s2295_s6 }
 0x6bf   : > { %p1892_p12 = pnand %p1891_p11, %p2254_p5 }
 0x6c1   : > { %p1893_p13 = pneg %p1892_p12 }
 0x6c3   : > { %p1898_p1 = pnand %p1896_p0, %p1893_p13 }
 0x6c5   : > { %1901 = shalt.err (!%p1898_p1)
}
 0x6c6   : > { %1697 = dma.vmem_to_hbm [thread:$0]  (%p2254_p5), %s1253_s9, 128, %s2295_s6, [#allocation7]  }
 0x6c7   : > { %1927 = dma.done.wait (%p2254_p5), [#allocation7], 128  }
 0x6c8   : > { %1929 = vsyncadd (%p2254_p5), [#allocation7], 4294967168 }
 0x6c9 PF: > { %s24_s23 = sadd.s32 1, %s1940_s23   ;;  %s2307_s21 = smov %s1936_s22 }
 0x6ca   : > { %p21_p2 = scmp.ge.s32.totalorder %s24_s23, 6   ;;  %s2308_s22 = smov %s2310_s25 }
 0x6cc   :  { %23 = sbr.rel (!%p21_p2) target bundleno = 7 (0x7), region = 126 }
 0x6d3   :  { %1265 = vsyncpa [#allocation6], 1 }
 0x6d4   :  { %1267 = vsyncpa [#allocation6 + $0x1], 1 }
 0x6d5   :  { %1268 = vsyncpa [#allocation9], 1 }
 0x6d6   :  { %1269 = vsyncpa [#allocation12], 1 }
 0x6d7   :  { %1271 = vsyncpa [#allocation12 + $0x1], 1 }
 0x6d8   :  { %1272 = vsyncpa [#allocation7], 1 }
 0x6d9   :  { %1274 = vsyncpa [#allocation7 + $0x1], 1 }

</bundles_post_ra>
